<compile_context>
chip_gen: v6e
topology: v6e:2x2x1
jax: 0.10.0
libtpu: 0.0.40
codegen_flags: <defaults>
</compile_context>

<pallas_src>
import functools

import jax
import jax.numpy as jnp
import numpy as np
from jax.experimental import pallas as pl
from jax.experimental.pallas import tpu as pltpu

EPS = 1e-6


def _t5_adapter_kernel(h_ref, lnw_ref, wq_ref, wk_ref, wv_ref, wo_ref,
                       bias_ref, wd_ref, bd_ref, wu_ref, bu_ref,
                       o_ref, normed_scr, kt_scr, v_scr, ctx_scr,
                       *, n_heads, head_dim, q_tile):
    qi = pl.program_id(1)

    # ---- once per batch element: RMS norm + K/V projection -----------------
    # h_ref's block index is constant across the q-tile axis, so these
    # scratches persist until the batch element changes.
    @pl.when(qi == 0)
    def _():
        x = h_ref[0]                                                    # [S, D] f32
        var = jnp.mean(x * x, axis=-1, keepdims=True)
        normed = (x * jax.lax.rsqrt(var + EPS) * lnw_ref[0]).astype(jnp.bfloat16)
        normed_scr[...] = normed
        k_full = jnp.dot(normed, wk_ref[...],
                         preferred_element_type=jnp.float32).astype(jnp.bfloat16)
        v_full = jnp.dot(normed, wv_ref[...],
                         preferred_element_type=jnp.float32).astype(jnp.bfloat16)
        # Head-major scratch; K is pre-transposed once here so the hot loop
        # below never pays a per-step transpose / relayout.
        for h in range(n_heads):
            lo = h * head_dim
            kt_scr[h] = k_full[:, lo:lo + head_dim].T                   # [hd, S]
            v_scr[h] = v_full[:, lo:lo + head_dim]                      # [S, hd]

    # ---- query tile ----------------------------------------------------------
    q_start = pl.multiple_of(qi * q_tile, q_tile)
    x_q = h_ref[0, pl.ds(q_start, q_tile), :]                           # [tq, D] f32 (residual)
    normed_q = normed_scr[pl.ds(q_start, q_tile), :]                    # [tq, D] bf16 (cached)
    q = jnp.dot(normed_q, wq_ref[...],
                preferred_element_type=jnp.float32)                     # [tq, ID] f32

    # Static unroll over heads (fine for typical H).
    # TODO(synk): for very large H switch to lax.fori_loop(..., unroll=2) with
    # pl.ds(h * head_dim, head_dim) slices to bound live (tq, S) temporaries.
    for h in range(n_heads):
        lo = h * head_dim
        qh = q[:, lo:lo + head_dim].astype(jnp.bfloat16)                # [tq, hd]
        s = jnp.dot(qh, kt_scr[h], preferred_element_type=jnp.float32)  # [tq, S]
        s = s + bias_ref[h].astype(jnp.float32)                         # bias streamed as bf16
        # NOTE: fully-masked rows (all -inf from a folded mask) produce NaN
        # exactly as the PyTorch reference does; intentionally not guarded.
        s = s - jnp.max(s, axis=-1, keepdims=True)
        e = jnp.exp(s)
        p = e * pl.reciprocal(jnp.sum(e, axis=-1, keepdims=True), approx=True)
        ctx = jnp.dot(p.astype(jnp.bfloat16), v_scr[h],
                      preferred_element_type=jnp.float32)               # [tq, hd]
        ctx_scr[:, lo:lo + head_dim] = ctx.astype(jnp.bfloat16)

    # ---- fused output projection: one full-K matmul --------------------------
    attn = jnp.dot(ctx_scr[...], wo_ref[...],
                   preferred_element_type=jnp.float32)                  # [tq, D]

    # ---- adapter (down -> ReLU -> up) + residuals ----------------------------
    # TODO(synk): nn.Dropout is identity in eval mode; no RNG path implemented.
    down = jnp.dot(attn.astype(jnp.bfloat16), wd_ref[...],
                   preferred_element_type=jnp.float32) + bd_ref[0]
    act = jnp.maximum(down, 0.0)
    up = jnp.dot(act.astype(jnp.bfloat16), wu_ref[...],
                 preferred_element_type=jnp.float32) + bu_ref[0]

    o_ref[0] = up + attn + x_q


def _vmem_bytes(S, D, ID, A, H, tq):
    """Conservative per-core working-set estimate (assumes double buffering)."""
    f32, bf16 = 4, 2
    weights = (3 * D * ID + ID * D + D * A + A * D) * bf16 + (2 * D + A) * f32
    est = 2 * weights                          # weights / biases (worst case 2 bufs)
    est += 2 * S * D * f32                     # hidden block (worst case 2 bufs)
    est += 2 * H * tq * S * bf16               # position-bias tile (bf16, 2 bufs)
    est += 2 * tq * D * f32                    # output tile
    est += 2 * S * ID * bf16                   # K^T / V head-major scratch
    est += S * D * bf16                        # cached RMS-normed activations
    est += tq * ID * bf16                      # per-tile context scratch
    est += 3 * tq * S * f32 + tq * ID * f32 + 3 * tq * D * f32 + tq * A * f32
    return est


def t5_adapter_self_attention(hidden, ln_w, wq, wk, wv, wo, pos_bias,
                              w_down, b_down, w_up, b_up,
                              *, n_heads, head_dim, q_tile=256):
    B, S, D = hidden.shape
    ID = n_heads * head_dim
    A = w_down.shape[1]

    # ---- generation-aware VMEM budget ---------------------------------------
    try:
        vmem_cap = int(pltpu.get_tpu_info().vmem_capacity_bytes)
    except Exception:
        vmem_cap = 64 * 1024 * 1024            # conservative default: v7x per-core
    budget = int(vmem_cap * 0.85)              # leave headroom for Mosaic scratch

    # ---- pick the q tile (shrink until the working set fits the budget) -----
    tq = min(q_tile, S)
    assert S % tq == 0, "sequence length must be a multiple of the q tile"
    while (tq > 128 and tq % 2 == 0 and S % (tq // 2) == 0
           and _vmem_bytes(S, D, ID, A, n_heads, tq) > budget):
        tq //= 2
    n_q = S // tq

    est = _vmem_bytes(S, D, ID, A, n_heads, tq)
    vmem_limit = min(max(int(est * 1.3), 32 * 1024 * 1024), budget)

    kernel = functools.partial(_t5_adapter_kernel,
                               n_heads=n_heads, head_dim=head_dim, q_tile=tq)

    # bf16 MXU operands (f32 accumulation in-kernel); LN weight and adapter
    # biases stay f32. Position bias -> bf16 (largest streamed operand).
    wq_b = wq.astype(jnp.bfloat16)
    wk_b = wk.astype(jnp.bfloat16)
    wv_b = wv.astype(jnp.bfloat16)
    wo_b = wo.astype(jnp.bfloat16)
    wd_b = w_down.astype(jnp.bfloat16)
    wu_b = w_up.astype(jnp.bfloat16)
    bias_b = pos_bias.astype(jnp.bfloat16)

    def build(use_single_buffer):
        def const_spec(shape):
            idx = lambda b, qi, _n=len(shape): (0,) * _n
            if use_single_buffer:
                return pl.BlockSpec(shape, idx, pipeline_mode=pl.Buffered(1))
            return pl.BlockSpec(shape, idx)

        if use_single_buffer:
            hidden_spec = pl.BlockSpec((1, S, D), lambda b, qi: (b, 0, 0),
                                       pipeline_mode=pl.Buffered(1))
        else:
            hidden_spec = pl.BlockSpec((1, S, D), lambda b, qi: (b, 0, 0))

        return pl.pallas_call(
            kernel,
            out_shape=jax.ShapeDtypeStruct((B, S, D), jnp.float32),
            grid_spec=pltpu.PrefetchScalarGridSpec(
                num_scalar_prefetch=0,
                grid=(B, n_q),
                in_specs=[
                    hidden_spec,                                           # hidden (full S)
                    const_spec((1, D)),                                    # layer-norm weight
                    const_spec((D, ID)),                                   # Wq
                    const_spec((D, ID)),                                   # Wk
                    const_spec((D, ID)),                                   # Wv
                    const_spec((ID, D)),                                   # Wo
                    pl.BlockSpec((n_heads, tq, S),
                                 lambda b, qi: (0, qi, 0)),                # pos bias (+mask), bf16
                    const_spec((D, A)),                                    # adapter down W
                    const_spec((1, A)),                                    # adapter down b
                    const_spec((A, D)),                                    # adapter up W
                    const_spec((1, D)),                                    # adapter up b
                ],
                out_specs=pl.BlockSpec((1, tq, D), lambda b, qi: (b, qi, 0)),
                scratch_shapes=[
                    pltpu.VMEM((S, D), jnp.bfloat16),                      # cached RMS-normed acts
                    pltpu.VMEM((n_heads, head_dim, S), jnp.bfloat16),      # K^T, head-major
                    pltpu.VMEM((n_heads, S, head_dim), jnp.bfloat16),      # V,   head-major
                    pltpu.VMEM((tq, ID), jnp.bfloat16),                    # per-tile context
                ],
            ),
            compiler_params=pltpu.CompilerParams(
                # Batch axis is megacore-parallel; the q-tile axis carries the
                # K/V / normed scratch so it must stay sequential.
                # TODO(synk): at B == 1 on v7x, shard the q-tile axis across the
                # 2 TensorCores (core_map) with per-core redundant K/V scratch.
                dimension_semantics=("parallel", "arbitrary"),
                vmem_limit_bytes=vmem_limit,
            ),
        )

    args = (hidden, ln_w, wq_b, wk_b, wv_b, wo_b, bias_b, wd_b, b_down, wu_b, b_up)
    if hasattr(pl, "Buffered"):
        try:
            return build(True)(*args)
        except Exception:
            # Narrow fallback only for builds that reject pipeline_mode=Buffered(1).
            # tq / vmem_limit were sized with the double-buffered estimate, so this
            # retry never requests more VMEM than was already budgeted; any genuine
            # kernel error will re-raise from the call below.
            pass
    return build(False)(*args)


def _reference(hidden, ln_w, wq, wk, wv, wo, pos_bias, w_down, b_down, w_up, b_up,
               *, n_heads, head_dim):
    B, S, D = hidden.shape
    var = jnp.mean(hidden * hidden, axis=-1, keepdims=True)
    normed = hidden * jax.lax.rsqrt(var + EPS) * ln_w[0]
    q = normed @ wq
    k = normed @ wk
    v = normed @ wv
    qh = q.reshape(B, S, n_heads, head_dim).transpose(0, 2, 1, 3)
    kh = k.reshape(B, S, n_heads, head_dim).transpose(0, 2, 1, 3)
    vh = v.reshape(B, S, n_heads, head_dim).transpose(0, 2, 1, 3)
    scores = jnp.einsum("bhqd,bhkd->bhqk", qh, kh) + pos_bias[None]
    p = jax.nn.softmax(scores, axis=-1)
    ctx = jnp.einsum("bhqk,bhkd->bhqd", p, vh).transpose(0, 2, 1, 3).reshape(B, S, -1)
    attn_out = ctx @ wo
    up = jnp.maximum(attn_out @ w_down + b_down[0], 0.0) @ w_up + b_up[0]
    return up + attn_out + hidden


if __name__ == "__main__":
    B, S, D = 2, 8, 32          # batch, seq, d_model
    H, HD = 4, 8                # heads, head_dim (H*HD == inner_dim == D)
    A = 16                      # adapter bottleneck size

    key = jax.random.PRNGKey(0)
    ks = jax.random.split(key, 12)
    hidden = jax.random.normal(ks[0], (B, S, D), jnp.float32)
    ln_w = jax.random.normal(ks[1], (1, D), jnp.float32) * 0.1 + 1.0
    wq = jax.random.normal(ks[2], (D, H * HD), jnp.float32) * 0.05
    wk = jax.random.normal(ks[3], (D, H * HD), jnp.float32) * 0.05
    wv = jax.random.normal(ks[4], (D, H * HD), jnp.float32) * 0.05
    wo = jax.random.normal(ks[5], (H * HD, D), jnp.float32) * 0.05
    pos_bias = jax.random.normal(ks[6], (H, S, S), jnp.float32) * 0.1  # rel-pos bias (+mask)
    w_down = jax.random.normal(ks[7], (D, A), jnp.float32) * 0.05
    b_down = jax.random.normal(ks[8], (1, A), jnp.float32) * 0.01
    w_up = jax.random.normal(ks[9], (A, D), jnp.float32) * 0.05
    b_up = jax.random.normal(ks[10], (1, D), jnp.float32) * 0.01

    out = t5_adapter_self_attention(hidden, ln_w, wq, wk, wv, wo, pos_bias,
                                    w_down, b_down, w_up, b_up,
                                    n_heads=H, head_dim=HD)
    out = jax.block_until_ready(out)

    ref = _reference(hidden, ln_w, wq, wk, wv, wo, pos_bias, w_down, b_down,
                     w_up, b_up, n_heads=H, head_dim=HD)
    # Tolerance relaxed vs an all-f32 kernel: matmuls use bf16 operands (f32
    # accumulation), the position bias is streamed in bf16, and the softmax
    # uses the EUP approximate reciprocal.
    np.testing.assert_allclose(np.asarray(out), np.asarray(ref), atol=2e-2, rtol=2e-2)

    print("KERNEL_OK")
</pallas_src>

<mosaic_0001>
module attributes {stable_mosaic.version = 11 : i64} {
  func.func @_t5_adapter_kernel(%arg0: i32, %arg1: i32, %arg2: memref<1x8x32xf32, #tpu.memory_space<vmem>>, %arg3: memref<1x32xf32, #tpu.memory_space<vmem>>, %arg4: memref<32x32xbf16, #tpu.memory_space<vmem>>, %arg5: memref<32x32xbf16, #tpu.memory_space<vmem>>, %arg6: memref<32x32xbf16, #tpu.memory_space<vmem>>, %arg7: memref<32x32xbf16, #tpu.memory_space<vmem>>, %arg8: memref<4x8x8xbf16, #tpu.memory_space<vmem>>, %arg9: memref<32x16xbf16, #tpu.memory_space<vmem>>, %arg10: memref<1x16xf32, #tpu.memory_space<vmem>>, %arg11: memref<16x32xbf16, #tpu.memory_space<vmem>>, %arg12: memref<1x32xf32, #tpu.memory_space<vmem>>, %arg13: memref<1x8x32xf32, #tpu.memory_space<vmem>>, %arg14: memref<8x32xbf16, #tpu.memory_space<vmem>>, %arg15: memref<4x8x8xbf16, #tpu.memory_space<vmem>>, %arg16: memref<4x8x8xbf16, #tpu.memory_space<vmem>>, %arg17: memref<8x32xbf16, #tpu.memory_space<vmem>>) attributes {dimension_semantics = [#tpu.dimension_semantics<parallel>, #tpu.dimension_semantics<arbitrary>], iteration_bounds = array<i64: 2, 1>, scalar_prefetch = 0 : i64, scratch_operands = 4 : i64, tpu.core_type = #tpu.core_type<tc>, window_params = [{pipeline_mode = #tpu.pipeline_mode<synchronous>, transform_indices = @transform_0, window_bounds = array<i64: 1, 8, 32>}, {pipeline_mode = #tpu.pipeline_mode<synchronous>, transform_indices = @transform_1, window_bounds = array<i64: 1, 32>}, {pipeline_mode = #tpu.pipeline_mode<synchronous>, transform_indices = @transform_2, window_bounds = array<i64: 32, 32>}, {pipeline_mode = #tpu.pipeline_mode<synchronous>, transform_indices = @transform_3, window_bounds = array<i64: 32, 32>}, {pipeline_mode = #tpu.pipeline_mode<synchronous>, transform_indices = @transform_4, window_bounds = array<i64: 32, 32>}, {pipeline_mode = #tpu.pipeline_mode<synchronous>, transform_indices = @transform_5, window_bounds = array<i64: 32, 32>}, {transform_indices = @transform_6, window_bounds = array<i64: 4, 8, 8>}, {pipeline_mode = #tpu.pipeline_mode<synchronous>, transform_indices = @transform_7, window_bounds = array<i64: 32, 16>}, {pipeline_mode = #tpu.pipeline_mode<synchronous>, transform_indices = @transform_8, window_bounds = array<i64: 1, 16>}, {pipeline_mode = #tpu.pipeline_mode<synchronous>, transform_indices = @transform_9, window_bounds = array<i64: 16, 32>}, {pipeline_mode = #tpu.pipeline_mode<synchronous>, transform_indices = @transform_10, window_bounds = array<i64: 1, 32>}, {transform_indices = @transform_11, window_bounds = array<i64: 1, 8, 32>}]} {
    %c0_i32 = arith.constant 0 : i32
    %0 = arith.cmpi eq, %arg1, %c0_i32 : i32
    %1 = arith.extui %0 : i1 to i32
    %c0_i32_0 = arith.constant 0 : i32
    %2 = arith.cmpi ne, %1, %c0_i32_0 : i32
    scf.if %2 {
      %c0_78 = arith.constant 0 : index
      %c0_79 = arith.constant 0 : index
      %c0_80 = arith.constant 0 : index
      %138 = vector.load %arg2[%c0_78, %c0_79, %c0_80] : memref<1x8x32xf32, #tpu.memory_space<vmem>>, vector<1x8x32xf32>
      %139 = vector.shape_cast %138 : vector<1x8x32xf32> to vector<8x32xf32>
      %140 = arith.mulf %139, %139 : vector<8x32xf32>
      %cst_81 = arith.constant dense<0.000000e+00> : vector<8xf32>
      %141 = vector.multi_reduction <add>, %140, %cst_81 [1] : vector<8x32xf32> to vector<8xf32>
      %142 = vector.shape_cast %141 : vector<8xf32> to vector<8x1xf32>
      %cst_82 = arith.constant 3.200000e+01 : f32
      %143 = vector.broadcast %cst_82 : f32 to vector<8x1xf32>
      %144 = arith.divf %142, %143 : vector<8x1xf32>
      %cst_83 = arith.constant 9.99999997E-7 : f32
      %145 = vector.broadcast %cst_83 : f32 to vector<8x1xf32>
      %146 = arith.addf %144, %145 : vector<8x1xf32>
      %147 = math.rsqrt %146 : vector<8x1xf32>
      %148 = vector.broadcast %147 : vector<8x1xf32> to vector<8x32xf32>
      %149 = arith.mulf %139, %148 : vector<8x32xf32>
      %c0_84 = arith.constant 0 : index
      %c0_85 = arith.constant 0 : index
      %150 = vector.load %arg3[%c0_84, %c0_85] : memref<1x32xf32, #tpu.memory_space<vmem>>, vector<1x32xf32>
      %151 = vector.shape_cast %150 : vector<1x32xf32> to vector<32xf32>
      %152 = vector.shape_cast %151 : vector<32xf32> to vector<1x32xf32>
      %153 = vector.broadcast %152 : vector<1x32xf32> to vector<8x32xf32>
      %154 = arith.mulf %149, %153 : vector<8x32xf32>
      %155 = arith.truncf %154 : vector<8x32xf32> to vector<8x32xbf16>
      %c0_86 = arith.constant 0 : index
      %c0_87 = arith.constant 0 : index
      %156 = vector.load %arg14[%c0_86, %c0_87] : memref<8x32xbf16, #tpu.memory_space<vmem>>, vector<8x32xbf16>
      tpu.vector_store %arg14[%c0_86, %c0_87], %155 {strides = array<i32>} : memref<8x32xbf16, #tpu.memory_space<vmem>>, vector<8x32xbf16>,
      %c0_88 = arith.constant 0 : index
      %c0_89 = arith.constant 0 : index
      %157 = vector.load %arg5[%c0_88, %c0_89] : memref<32x32xbf16, #tpu.memory_space<vmem>>, vector<32x32xbf16>
      %cst_90 = arith.constant dense<0.000000e+00> : vector<8x32xf32>
      %158 = tpu.matmul %155, %157, %cst_90 {dimension_numbers = #tpu.dot_dimension_numbers<[1], [0], [0], [1], [0, 0, 1, 1], [], []>} : vector<8x32xbf16>, vector<32x32xbf16>, vector<8x32xf32> -> vector<8x32xf32>
      %159 = arith.truncf %158 : vector<8x32xf32> to vector<8x32xbf16>
      %c0_91 = arith.constant 0 : index
      %c0_92 = arith.constant 0 : index
      %160 = vector.load %arg6[%c0_91, %c0_92] : memref<32x32xbf16, #tpu.memory_space<vmem>>, vector<32x32xbf16>
      %cst_93 = arith.constant dense<0.000000e+00> : vector<8x32xf32>
      %161 = tpu.matmul %155, %160, %cst_93 {dimension_numbers = #tpu.dot_dimension_numbers<[1], [0], [0], [1], [0, 0, 1, 1], [], []>} : vector<8x32xbf16>, vector<32x32xbf16>, vector<8x32xf32> -> vector<8x32xf32>
      %162 = arith.truncf %161 : vector<8x32xf32> to vector<8x32xbf16>
      %163 = vector.extract_strided_slice %159 {offsets = [0, 0], sizes = [8, 8], strides = [1, 1]} : vector<8x32xbf16> to vector<8x8xbf16>
      %164 = tpu.transpose %163, [1, 0] : vector<8x8xbf16> -> vector<8x8xbf16>
      %c0_94 = arith.constant 0 : index
      %c0_95 = arith.constant 0 : index
      %c0_96 = arith.constant 0 : index
      %165 = vector.load %arg15[%c0_94, %c0_95, %c0_96] : memref<4x8x8xbf16, #tpu.memory_space<vmem>>, vector<1x8x8xbf16>
      %166 = vector.shape_cast %165 : vector<1x8x8xbf16> to vector<8x8xbf16>
      %167 = vector.shape_cast %164 : vector<8x8xbf16> to vector<1x8x8xbf16>
      tpu.vector_store %arg15[%c0_94, %c0_95, %c0_96], %167 {strides = array<i32>} : memref<4x8x8xbf16, #tpu.memory_space<vmem>>, vector<1x8x8xbf16>,
      %168 = vector.extract_strided_slice %162 {offsets = [0, 0], sizes = [8, 8], strides = [1, 1]} : vector<8x32xbf16> to vector<8x8xbf16>
      %c0_97 = arith.constant 0 : index
      %c0_98 = arith.constant 0 : index
      %c0_99 = arith.constant 0 : index
      %169 = vector.load %arg16[%c0_97, %c0_98, %c0_99] : memref<4x8x8xbf16, #tpu.memory_space<vmem>>, vector<1x8x8xbf16>
      %170 = vector.shape_cast %169 : vector<1x8x8xbf16> to vector<8x8xbf16>
      %171 = vector.shape_cast %168 : vector<8x8xbf16> to vector<1x8x8xbf16>
      tpu.vector_store %arg16[%c0_97, %c0_98, %c0_99], %171 {strides = array<i32>} : memref<4x8x8xbf16, #tpu.memory_space<vmem>>, vector<1x8x8xbf16>,
      %172 = vector.extract_strided_slice %159 {offsets = [0, 8], sizes = [8, 8], strides = [1, 1]} : vector<8x32xbf16> to vector<8x8xbf16>
      %173 = tpu.transpose %172, [1, 0] : vector<8x8xbf16> -> vector<8x8xbf16>
      %c1_100 = arith.constant 1 : index
      %c0_101 = arith.constant 0 : index
      %c0_102 = arith.constant 0 : index
      %174 = vector.load %arg15[%c1_100, %c0_101, %c0_102] : memref<4x8x8xbf16, #tpu.memory_space<vmem>>, vector<1x8x8xbf16>
      %175 = vector.shape_cast %174 : vector<1x8x8xbf16> to vector<8x8xbf16>
      %176 = vector.shape_cast %173 : vector<8x8xbf16> to vector<1x8x8xbf16>
      tpu.vector_store %arg15[%c1_100, %c0_101, %c0_102], %176 {strides = array<i32>} : memref<4x8x8xbf16, #tpu.memory_space<vmem>>, vector<1x8x8xbf16>,
      %177 = vector.extract_strided_slice %162 {offsets = [0, 8], sizes = [8, 8], strides = [1, 1]} : vector<8x32xbf16> to vector<8x8xbf16>
      %c1_103 = arith.constant 1 : index
      %c0_104 = arith.constant 0 : index
      %c0_105 = arith.constant 0 : index
      %178 = vector.load %arg16[%c1_103, %c0_104, %c0_105] : memref<4x8x8xbf16, #tpu.memory_space<vmem>>, vector<1x8x8xbf16>
      %179 = vector.shape_cast %178 : vector<1x8x8xbf16> to vector<8x8xbf16>
      %180 = vector.shape_cast %177 : vector<8x8xbf16> to vector<1x8x8xbf16>
      tpu.vector_store %arg16[%c1_103, %c0_104, %c0_105], %180 {strides = array<i32>} : memref<4x8x8xbf16, #tpu.memory_space<vmem>>, vector<1x8x8xbf16>,
      %181 = vector.extract_strided_slice %159 {offsets = [0, 16], sizes = [8, 8], strides = [1, 1]} : vector<8x32xbf16> to vector<8x8xbf16>
      %182 = tpu.transpose %181, [1, 0] : vector<8x8xbf16> -> vector<8x8xbf16>
      %c2_106 = arith.constant 2 : index
      %c0_107 = arith.constant 0 : index
      %c0_108 = arith.constant 0 : index
      %183 = vector.load %arg15[%c2_106, %c0_107, %c0_108] : memref<4x8x8xbf16, #tpu.memory_space<vmem>>, vector<1x8x8xbf16>
      %184 = vector.shape_cast %183 : vector<1x8x8xbf16> to vector<8x8xbf16>
      %185 = vector.shape_cast %182 : vector<8x8xbf16> to vector<1x8x8xbf16>
      tpu.vector_store %arg15[%c2_106, %c0_107, %c0_108], %185 {strides = array<i32>} : memref<4x8x8xbf16, #tpu.memory_space<vmem>>, vector<1x8x8xbf16>,
      %186 = vector.extract_strided_slice %162 {offsets = [0, 16], sizes = [8, 8], strides = [1, 1]} : vector<8x32xbf16> to vector<8x8xbf16>
      %c2_109 = arith.constant 2 : index
      %c0_110 = arith.constant 0 : index
      %c0_111 = arith.constant 0 : index
      %187 = vector.load %arg16[%c2_109, %c0_110, %c0_111] : memref<4x8x8xbf16, #tpu.memory_space<vmem>>, vector<1x8x8xbf16>
      %188 = vector.shape_cast %187 : vector<1x8x8xbf16> to vector<8x8xbf16>
      %189 = vector.shape_cast %186 : vector<8x8xbf16> to vector<1x8x8xbf16>
      tpu.vector_store %arg16[%c2_109, %c0_110, %c0_111], %189 {strides = array<i32>} : memref<4x8x8xbf16, #tpu.memory_space<vmem>>, vector<1x8x8xbf16>,
      %190 = vector.extract_strided_slice %159 {offsets = [0, 24], sizes = [8, 8], strides = [1, 1]} : vector<8x32xbf16> to vector<8x8xbf16>
      %191 = tpu.transpose %190, [1, 0] : vector<8x8xbf16> -> vector<8x8xbf16>
      %c3_112 = arith.constant 3 : index
      %c0_113 = arith.constant 0 : index
      %c0_114 = arith.constant 0 : index
      %192 = vector.load %arg15[%c3_112, %c0_113, %c0_114] : memref<4x8x8xbf16, #tpu.memory_space<vmem>>, vector<1x8x8xbf16>
      %193 = vector.shape_cast %192 : vector<1x8x8xbf16> to vector<8x8xbf16>
      %194 = vector.shape_cast %191 : vector<8x8xbf16> to vector<1x8x8xbf16>
      tpu.vector_store %arg15[%c3_112, %c0_113, %c0_114], %194 {strides = array<i32>} : memref<4x8x8xbf16, #tpu.memory_space<vmem>>, vector<1x8x8xbf16>,
      %195 = vector.extract_strided_slice %162 {offsets = [0, 24], sizes = [8, 8], strides = [1, 1]} : vector<8x32xbf16> to vector<8x8xbf16>
      %c3_115 = arith.constant 3 : index
      %c0_116 = arith.constant 0 : index
      %c0_117 = arith.constant 0 : index
      %196 = vector.load %arg16[%c3_115, %c0_116, %c0_117] : memref<4x8x8xbf16, #tpu.memory_space<vmem>>, vector<1x8x8xbf16>
      %197 = vector.shape_cast %196 : vector<1x8x8xbf16> to vector<8x8xbf16>
      %198 = vector.shape_cast %195 : vector<8x8xbf16> to vector<1x8x8xbf16>
      tpu.vector_store %arg16[%c3_115, %c0_116, %c0_117], %198 {strides = array<i32>} : memref<4x8x8xbf16, #tpu.memory_space<vmem>>, vector<1x8x8xbf16>,
    } else {
    }
    %c8_i32 = arith.constant 8 : i32
    %3 = arith.muli %arg1, %c8_i32 : i32
    %4 = tpu.assume_multiple %3, 8 : i32
    %c0 = arith.constant 0 : index
    %5 = arith.index_cast %4 : i32 to index
    %c0_1 = arith.constant 0 : index
    %6 = vector.load %arg2[%c0, %5, %c0_1] : memref<1x8x32xf32, #tpu.memory_space<vmem>>, vector<1x8x32xf32>
    %7 = vector.shape_cast %6 : vector<1x8x32xf32> to vector<8x32xf32>
    %8 = arith.index_cast %4 : i32 to index
    %c0_2 = arith.constant 0 : index
    %9 = vector.load %arg14[%8, %c0_2] : memref<8x32xbf16, #tpu.memory_space<vmem>>, vector<8x32xbf16>
    %c0_3 = arith.constant 0 : index
    %c0_4 = arith.constant 0 : index
    %10 = vector.load %arg4[%c0_3, %c0_4] : memref<32x32xbf16, #tpu.memory_space<vmem>>, vector<32x32xbf16>
    %cst = arith.constant dense<0.000000e+00> : vector<8x32xf32>
    %11 = tpu.matmul %9, %10, %cst {dimension_numbers = #tpu.dot_dimension_numbers<[1], [0], [0], [1], [0, 0, 1, 1], [], []>} : vector<8x32xbf16>, vector<32x32xbf16>, vector<8x32xf32> -> vector<8x32xf32>
    %12 = vector.extract_strided_slice %11 {offsets = [0, 0], sizes = [8, 8], strides = [1, 1]} : vector<8x32xf32> to vector<8x8xf32>
    %13 = arith.truncf %12 : vector<8x8xf32> to vector<8x8xbf16>
    %c0_5 = arith.constant 0 : index
    %c0_6 = arith.constant 0 : index
    %c0_7 = arith.constant 0 : index
    %14 = vector.load %arg15[%c0_5, %c0_6, %c0_7] : memref<4x8x8xbf16, #tpu.memory_space<vmem>>, vector<1x8x8xbf16>
    %15 = vector.shape_cast %14 : vector<1x8x8xbf16> to vector<8x8xbf16>
    %cst_8 = arith.constant dense<0.000000e+00> : vector<8x8xf32>
    %16 = tpu.matmul %13, %15, %cst_8 {dimension_numbers = #tpu.dot_dimension_numbers<[1], [0], [0], [1], [0, 0, 1, 1], [], []>} : vector<8x8xbf16>, vector<8x8xbf16>, vector<8x8xf32> -> vector<8x8xf32>
    %c0_9 = arith.constant 0 : index
    %c0_10 = arith.constant 0 : index
    %c0_11 = arith.constant 0 : index
    %17 = vector.load %arg8[%c0_9, %c0_10, %c0_11] : memref<4x8x8xbf16, #tpu.memory_space<vmem>>, vector<1x8x8xbf16>
    %18 = vector.shape_cast %17 : vector<1x8x8xbf16> to vector<8x8xbf16>
    %19 = arith.extf %18 : vector<8x8xbf16> to vector<8x8xf32>
    %20 = arith.addf %16, %19 : vector<8x8xf32>
    %cst_12 = arith.constant dense<0xFF800000> : vector<8xf32>
    %21 = vector.multi_reduction <maximumf>, %20, %cst_12 [1] : vector<8x8xf32> to vector<8xf32>
    %22 = vector.shape_cast %21 : vector<8xf32> to vector<8x1xf32>
    %23 = vector.broadcast %22 : vector<8x1xf32> to vector<8x8xf32>
    %24 = arith.subf %20, %23 : vector<8x8xf32>
    %25 = math.exp %24 : vector<8x8xf32>
    %cst_13 = arith.constant dense<0.000000e+00> : vector<8xf32>
    %26 = vector.multi_reduction <add>, %25, %cst_13 [1] : vector<8x8xf32> to vector<8xf32>
    %27 = vector.shape_cast %26 : vector<8xf32> to vector<8x1xf32>
    %28 = tpu.reciprocal %27 {approx = true} : vector<8x1xf32> -> vector<8x1xf32>
    %29 = vector.broadcast %28 : vector<8x1xf32> to vector<8x8xf32>
    %30 = arith.mulf %25, %29 : vector<8x8xf32>
    %31 = arith.truncf %30 : vector<8x8xf32> to vector<8x8xbf16>
    %c0_14 = arith.constant 0 : index
    %c0_15 = arith.constant 0 : index
    %c0_16 = arith.constant 0 : index
    %32 = vector.load %arg16[%c0_14, %c0_15, %c0_16] : memref<4x8x8xbf16, #tpu.memory_space<vmem>>, vector<1x8x8xbf16>
    %33 = vector.shape_cast %32 : vector<1x8x8xbf16> to vector<8x8xbf16>
    %cst_17 = arith.constant dense<0.000000e+00> : vector<8x8xf32>
    %34 = tpu.matmul %31, %33, %cst_17 {dimension_numbers = #tpu.dot_dimension_numbers<[1], [0], [0], [1], [0, 0, 1, 1], [], []>} : vector<8x8xbf16>, vector<8x8xbf16>, vector<8x8xf32> -> vector<8x8xf32>
    %35 = arith.truncf %34 : vector<8x8xf32> to vector<8x8xbf16>
    %c0_18 = arith.constant 0 : index
    %c0_19 = arith.constant 0 : index
    %36 = vector.load %arg17[%c0_18, %c0_19] : memref<8x32xbf16, #tpu.memory_space<vmem>>, vector<8x8xbf16>
    tpu.vector_store %arg17[%c0_18, %c0_19], %35 {strides = array<i32>} : memref<8x32xbf16, #tpu.memory_space<vmem>>, vector<8x8xbf16>,
    %37 = vector.extract_strided_slice %11 {offsets = [0, 8], sizes = [8, 8], strides = [1, 1]} : vector<8x32xf32> to vector<8x8xf32>
    %38 = arith.truncf %37 : vector<8x8xf32> to vector<8x8xbf16>
    %c1 = arith.constant 1 : index
    %c0_20 = arith.constant 0 : index
    %c0_21 = arith.constant 0 : index
    %39 = vector.load %arg15[%c1, %c0_20, %c0_21] : memref<4x8x8xbf16, #tpu.memory_space<vmem>>, vector<1x8x8xbf16>
    %40 = vector.shape_cast %39 : vector<1x8x8xbf16> to vector<8x8xbf16>
    %cst_22 = arith.constant dense<0.000000e+00> : vector<8x8xf32>
    %41 = tpu.matmul %38, %40, %cst_22 {dimension_numbers = #tpu.dot_dimension_numbers<[1], [0], [0], [1], [0, 0, 1, 1], [], []>} : vector<8x8xbf16>, vector<8x8xbf16>, vector<8x8xf32> -> vector<8x8xf32>
    %c1_23 = arith.constant 1 : index
    %c0_24 = arith.constant 0 : index
    %c0_25 = arith.constant 0 : index
    %42 = vector.load %arg8[%c1_23, %c0_24, %c0_25] : memref<4x8x8xbf16, #tpu.memory_space<vmem>>, vector<1x8x8xbf16>
    %43 = vector.shape_cast %42 : vector<1x8x8xbf16> to vector<8x8xbf16>
    %44 = arith.extf %43 : vector<8x8xbf16> to vector<8x8xf32>
    %45 = arith.addf %41, %44 : vector<8x8xf32>
    %cst_26 = arith.constant dense<0xFF800000> : vector<8xf32>
    %46 = vector.multi_reduction <maximumf>, %45, %cst_26 [1] : vector<8x8xf32> to vector<8xf32>
    %47 = vector.shape_cast %46 : vector<8xf32> to vector<8x1xf32>
    %48 = vector.broadcast %47 : vector<8x1xf32> to vector<8x8xf32>
    %49 = arith.subf %45, %48 : vector<8x8xf32>
    %50 = math.exp %49 : vector<8x8xf32>
    %cst_27 = arith.constant dense<0.000000e+00> : vector<8xf32>
    %51 = vector.multi_reduction <add>, %50, %cst_27 [1] : vector<8x8xf32> to vector<8xf32>
    %52 = vector.shape_cast %51 : vector<8xf32> to vector<8x1xf32>
    %53 = tpu.reciprocal %52 {approx = true} : vector<8x1xf32> -> vector<8x1xf32>
    %54 = vector.broadcast %53 : vector<8x1xf32> to vector<8x8xf32>
    %55 = arith.mulf %50, %54 : vector<8x8xf32>
    %56 = arith.truncf %55 : vector<8x8xf32> to vector<8x8xbf16>
    %c1_28 = arith.constant 1 : index
    %c0_29 = arith.constant 0 : index
    %c0_30 = arith.constant 0 : index
    %57 = vector.load %arg16[%c1_28, %c0_29, %c0_30] : memref<4x8x8xbf16, #tpu.memory_space<vmem>>, vector<1x8x8xbf16>
    %58 = vector.shape_cast %57 : vector<1x8x8xbf16> to vector<8x8xbf16>
    %cst_31 = arith.constant dense<0.000000e+00> : vector<8x8xf32>
    %59 = tpu.matmul %56, %58, %cst_31 {dimension_numbers = #tpu.dot_dimension_numbers<[1], [0], [0], [1], [0, 0, 1, 1], [], []>} : vector<8x8xbf16>, vector<8x8xbf16>, vector<8x8xf32> -> vector<8x8xf32>
    %60 = arith.truncf %59 : vector<8x8xf32> to vector<8x8xbf16>
    %c0_32 = arith.constant 0 : index
    %c8 = arith.constant 8 : index
    %61 = vector.load %arg17[%c0_32, %c8] : memref<8x32xbf16, #tpu.memory_space<vmem>>, vector<8x8xbf16>
    tpu.vector_store %arg17[%c0_32, %c8], %60 {strides = array<i32>} : memref<8x32xbf16, #tpu.memory_space<vmem>>, vector<8x8xbf16>,
    %62 = vector.extract_strided_slice %11 {offsets = [0, 16], sizes = [8, 8], strides = [1, 1]} : vector<8x32xf32> to vector<8x8xf32>
    %63 = arith.truncf %62 : vector<8x8xf32> to vector<8x8xbf16>
    %c2 = arith.constant 2 : index
    %c0_33 = arith.constant 0 : index
    %c0_34 = arith.constant 0 : index
    %64 = vector.load %arg15[%c2, %c0_33, %c0_34] : memref<4x8x8xbf16, #tpu.memory_space<vmem>>, vector<1x8x8xbf16>
    %65 = vector.shape_cast %64 : vector<1x8x8xbf16> to vector<8x8xbf16>
    %cst_35 = arith.constant dense<0.000000e+00> : vector<8x8xf32>
    %66 = tpu.matmul %63, %65, %cst_35 {dimension_numbers = #tpu.dot_dimension_numbers<[1], [0], [0], [1], [0, 0, 1, 1], [], []>} : vector<8x8xbf16>, vector<8x8xbf16>, vector<8x8xf32> -> vector<8x8xf32>
    %c2_36 = arith.constant 2 : index
    %c0_37 = arith.constant 0 : index
    %c0_38 = arith.constant 0 : index
    %67 = vector.load %arg8[%c2_36, %c0_37, %c0_38] : memref<4x8x8xbf16, #tpu.memory_space<vmem>>, vector<1x8x8xbf16>
    %68 = vector.shape_cast %67 : vector<1x8x8xbf16> to vector<8x8xbf16>
    %69 = arith.extf %68 : vector<8x8xbf16> to vector<8x8xf32>
    %70 = arith.addf %66, %69 : vector<8x8xf32>
    %cst_39 = arith.constant dense<0xFF800000> : vector<8xf32>
    %71 = vector.multi_reduction <maximumf>, %70, %cst_39 [1] : vector<8x8xf32> to vector<8xf32>
    %72 = vector.shape_cast %71 : vector<8xf32> to vector<8x1xf32>
    %73 = vector.broadcast %72 : vector<8x1xf32> to vector<8x8xf32>
    %74 = arith.subf %70, %73 : vector<8x8xf32>
    %75 = math.exp %74 : vector<8x8xf32>
    %cst_40 = arith.constant dense<0.000000e+00> : vector<8xf32>
    %76 = vector.multi_reduction <add>, %75, %cst_40 [1] : vector<8x8xf32> to vector<8xf32>
    %77 = vector.shape_cast %76 : vector<8xf32> to vector<8x1xf32>
    %78 = tpu.reciprocal %77 {approx = true} : vector<8x1xf32> -> vector<8x1xf32>
    %79 = vector.broadcast %78 : vector<8x1xf32> to vector<8x8xf32>
    %80 = arith.mulf %75, %79 : vector<8x8xf32>
    %81 = arith.truncf %80 : vector<8x8xf32> to vector<8x8xbf16>
    %c2_41 = arith.constant 2 : index
    %c0_42 = arith.constant 0 : index
    %c0_43 = arith.constant 0 : index
    %82 = vector.load %arg16[%c2_41, %c0_42, %c0_43] : memref<4x8x8xbf16, #tpu.memory_space<vmem>>, vector<1x8x8xbf16>
    %83 = vector.shape_cast %82 : vector<1x8x8xbf16> to vector<8x8xbf16>
    %cst_44 = arith.constant dense<0.000000e+00> : vector<8x8xf32>
    %84 = tpu.matmul %81, %83, %cst_44 {dimension_numbers = #tpu.dot_dimension_numbers<[1], [0], [0], [1], [0, 0, 1, 1], [], []>} : vector<8x8xbf16>, vector<8x8xbf16>, vector<8x8xf32> -> vector<8x8xf32>
    %85 = arith.truncf %84 : vector<8x8xf32> to vector<8x8xbf16>
    %c0_45 = arith.constant 0 : index
    %c16 = arith.constant 16 : index
    %86 = vector.load %arg17[%c0_45, %c16] : memref<8x32xbf16, #tpu.memory_space<vmem>>, vector<8x8xbf16>
    tpu.vector_store %arg17[%c0_45, %c16], %85 {strides = array<i32>} : memref<8x32xbf16, #tpu.memory_space<vmem>>, vector<8x8xbf16>,
    %87 = vector.extract_strided_slice %11 {offsets = [0, 24], sizes = [8, 8], strides = [1, 1]} : vector<8x32xf32> to vector<8x8xf32>
    %88 = arith.truncf %87 : vector<8x8xf32> to vector<8x8xbf16>
    %c3 = arith.constant 3 : index
    %c0_46 = arith.constant 0 : index
    %c0_47 = arith.constant 0 : index
    %89 = vector.load %arg15[%c3, %c0_46, %c0_47] : memref<4x8x8xbf16, #tpu.memory_space<vmem>>, vector<1x8x8xbf16>
    %90 = vector.shape_cast %89 : vector<1x8x8xbf16> to vector<8x8xbf16>
    %cst_48 = arith.constant dense<0.000000e+00> : vector<8x8xf32>
    %91 = tpu.matmul %88, %90, %cst_48 {dimension_numbers = #tpu.dot_dimension_numbers<[1], [0], [0], [1], [0, 0, 1, 1], [], []>} : vector<8x8xbf16>, vector<8x8xbf16>, vector<8x8xf32> -> vector<8x8xf32>
    %c3_49 = arith.constant 3 : index
    %c0_50 = arith.constant 0 : index
    %c0_51 = arith.constant 0 : index
    %92 = vector.load %arg8[%c3_49, %c0_50, %c0_51] : memref<4x8x8xbf16, #tpu.memory_space<vmem>>, vector<1x8x8xbf16>
    %93 = vector.shape_cast %92 : vector<1x8x8xbf16> to vector<8x8xbf16>
    %94 = arith.extf %93 : vector<8x8xbf16> to vector<8x8xf32>
    %95 = arith.addf %91, %94 : vector<8x8xf32>
    %cst_52 = arith.constant dense<0xFF800000> : vector<8xf32>
    %96 = vector.multi_reduction <maximumf>, %95, %cst_52 [1] : vector<8x8xf32> to vector<8xf32>
    %97 = vector.shape_cast %96 : vector<8xf32> to vector<8x1xf32>
    %98 = vector.broadcast %97 : vector<8x1xf32> to vector<8x8xf32>
    %99 = arith.subf %95, %98 : vector<8x8xf32>
    %100 = math.exp %99 : vector<8x8xf32>
    %cst_53 = arith.constant dense<0.000000e+00> : vector<8xf32>
    %101 = vector.multi_reduction <add>, %100, %cst_53 [1] : vector<8x8xf32> to vector<8xf32>
    %102 = vector.shape_cast %101 : vector<8xf32> to vector<8x1xf32>
    %103 = tpu.reciprocal %102 {approx = true} : vector<8x1xf32> -> vector<8x1xf32>
    %104 = vector.broadcast %103 : vector<8x1xf32> to vector<8x8xf32>
    %105 = arith.mulf %100, %104 : vector<8x8xf32>
    %106 = arith.truncf %105 : vector<8x8xf32> to vector<8x8xbf16>
    %c3_54 = arith.constant 3 : index
    %c0_55 = arith.constant 0 : index
    %c0_56 = arith.constant 0 : index
    %107 = vector.load %arg16[%c3_54, %c0_55, %c0_56] : memref<4x8x8xbf16, #tpu.memory_space<vmem>>, vector<1x8x8xbf16>
    %108 = vector.shape_cast %107 : vector<1x8x8xbf16> to vector<8x8xbf16>
    %cst_57 = arith.constant dense<0.000000e+00> : vector<8x8xf32>
    %109 = tpu.matmul %106, %108, %cst_57 {dimension_numbers = #tpu.dot_dimension_numbers<[1], [0], [0], [1], [0, 0, 1, 1], [], []>} : vector<8x8xbf16>, vector<8x8xbf16>, vector<8x8xf32> -> vector<8x8xf32>
    %110 = arith.truncf %109 : vector<8x8xf32> to vector<8x8xbf16>
    %c0_58 = arith.constant 0 : index
    %c24 = arith.constant 24 : index
    %111 = vector.load %arg17[%c0_58, %c24] : memref<8x32xbf16, #tpu.memory_space<vmem>>, vector<8x8xbf16>
    tpu.vector_store %arg17[%c0_58, %c24], %110 {strides = array<i32>} : memref<8x32xbf16, #tpu.memory_space<vmem>>, vector<8x8xbf16>,
    %c0_59 = arith.constant 0 : index
    %c0_60 = arith.constant 0 : index
    %112 = vector.load %arg17[%c0_59, %c0_60] : memref<8x32xbf16, #tpu.memory_space<vmem>>, vector<8x32xbf16>
    %c0_61 = arith.constant 0 : index
    %c0_62 = arith.constant 0 : index
    %113 = vector.load %arg7[%c0_61, %c0_62] : memref<32x32xbf16, #tpu.memory_space<vmem>>, vector<32x32xbf16>
    %cst_63 = arith.constant dense<0.000000e+00> : vector<8x32xf32>
    %114 = tpu.matmul %112, %113, %cst_63 {dimension_numbers = #tpu.dot_dimension_numbers<[1], [0], [0], [1], [0, 0, 1, 1], [], []>} : vector<8x32xbf16>, vector<32x32xbf16>, vector<8x32xf32> -> vector<8x32xf32>
    %115 = arith.truncf %114 : vector<8x32xf32> to vector<8x32xbf16>
    %c0_64 = arith.constant 0 : index
    %c0_65 = arith.constant 0 : index
    %116 = vector.load %arg9[%c0_64, %c0_65] : memref<32x16xbf16, #tpu.memory_space<vmem>>, vector<32x16xbf16>
    %cst_66 = arith.constant dense<0.000000e+00> : vector<8x16xf32>
    %117 = tpu.matmul %115, %116, %cst_66 {dimension_numbers = #tpu.dot_dimension_numbers<[1], [0], [0], [1], [0, 0, 1, 1], [], []>} : vector<8x32xbf16>, vector<32x16xbf16>, vector<8x16xf32> -> vector<8x16xf32>
    %c0_67 = arith.constant 0 : index
    %c0_68 = arith.constant 0 : index
    %118 = vector.load %arg10[%c0_67, %c0_68] : memref<1x16xf32, #tpu.memory_space<vmem>>, vector<1x16xf32>
    %119 = vector.shape_cast %118 : vector<1x16xf32> to vector<16xf32>
    %120 = vector.shape_cast %119 : vector<16xf32> to vector<1x16xf32>
    %121 = vector.broadcast %120 : vector<1x16xf32> to vector<8x16xf32>
    %122 = arith.addf %117, %121 : vector<8x16xf32>
    %cst_69 = arith.constant 0.000000e+00 : f32
    %123 = vector.broadcast %cst_69 : f32 to vector<8x16xf32>
    %124 = arith.maximumf %122, %123 : vector<8x16xf32>
    %125 = arith.truncf %124 : vector<8x16xf32> to vector<8x16xbf16>
    %c0_70 = arith.constant 0 : index
    %c0_71 = arith.constant 0 : index
    %126 = vector.load %arg11[%c0_70, %c0_71] : memref<16x32xbf16, #tpu.memory_space<vmem>>, vector<16x32xbf16>
    %cst_72 = arith.constant dense<0.000000e+00> : vector<8x32xf32>
    %127 = tpu.matmul %125, %126, %cst_72 {dimension_numbers = #tpu.dot_dimension_numbers<[1], [0], [0], [1], [0, 0, 1, 1], [], []>} : vector<8x16xbf16>, vector<16x32xbf16>, vector<8x32xf32> -> vector<8x32xf32>
    %c0_73 = arith.constant 0 : index
    %c0_74 = arith.constant 0 : index
    %128 = vector.load %arg12[%c0_73, %c0_74] : memref<1x32xf32, #tpu.memory_space<vmem>>, vector<1x32xf32>
    %129 = vector.shape_cast %128 : vector<1x32xf32> to vector<32xf32>
    %130 = vector.shape_cast %129 : vector<32xf32> to vector<1x32xf32>
    %131 = vector.broadcast %130 : vector<1x32xf32> to vector<8x32xf32>
    %132 = arith.addf %127, %131 : vector<8x32xf32>
    %133 = arith.addf %132, %114 : vector<8x32xf32>
    %134 = arith.addf %133, %7 : vector<8x32xf32>
    %c0_75 = arith.constant 0 : index
    %c0_76 = arith.constant 0 : index
    %c0_77 = arith.constant 0 : index
    %135 = vector.load %arg13[%c0_75, %c0_76, %c0_77] : memref<1x8x32xf32, #tpu.memory_space<vmem>>, vector<1x8x32xf32>
    %136 = vector.shape_cast %135 : vector<1x8x32xf32> to vector<8x32xf32>
    %137 = vector.shape_cast %134 : vector<8x32xf32> to vector<1x8x32xf32>
    tpu.vector_store %arg13[%c0_75, %c0_76, %c0_77], %137 {strides = array<i32>} : memref<1x8x32xf32, #tpu.memory_space<vmem>>, vector<1x8x32xf32>,
    return
  }
  func.func @transform_0(%arg0: i32, %arg1: i32) -> (i32, i32, i32) {
    %c0_i32 = arith.constant 0 : i32
    %c0_i32_0 = arith.constant 0 : i32
    %c0_i32_1 = arith.constant 0 : i32
    return %arg0, %c0_i32, %c0_i32_0 : i32, i32, i32
  }
  func.func @transform_1(%arg0: i32, %arg1: i32) -> (i32, i32) {
    %c0_i32 = arith.constant 0 : i32
    %c0_i32_0 = arith.constant 0 : i32
    %c0_i32_1 = arith.constant 0 : i32
    return %c0_i32, %c0_i32_0 : i32, i32
  }
  func.func @transform_2(%arg0: i32, %arg1: i32) -> (i32, i32) {
    %c0_i32 = arith.constant 0 : i32
    %c0_i32_0 = arith.constant 0 : i32
    %c0_i32_1 = arith.constant 0 : i32
    return %c0_i32, %c0_i32_0 : i32, i32
  }
  func.func @transform_3(%arg0: i32, %arg1: i32) -> (i32, i32) {
    %c0_i32 = arith.constant 0 : i32
    %c0_i32_0 = arith.constant 0 : i32
    %c0_i32_1 = arith.constant 0 : i32
    return %c0_i32, %c0_i32_0 : i32, i32
  }
  func.func @transform_4(%arg0: i32, %arg1: i32) -> (i32, i32) {
    %c0_i32 = arith.constant 0 : i32
    %c0_i32_0 = arith.constant 0 : i32
    %c0_i32_1 = arith.constant 0 : i32
    return %c0_i32, %c0_i32_0 : i32, i32
  }
  func.func @transform_5(%arg0: i32, %arg1: i32) -> (i32, i32) {
    %c0_i32 = arith.constant 0 : i32
    %c0_i32_0 = arith.constant 0 : i32
    %c0_i32_1 = arith.constant 0 : i32
    return %c0_i32, %c0_i32_0 : i32, i32
  }
  func.func @transform_6(%arg0: i32, %arg1: i32) -> (i32, i32, i32) {
    %c0_i32 = arith.constant 0 : i32
    %c0_i32_0 = arith.constant 0 : i32
    %c0_i32_1 = arith.constant 0 : i32
    return %c0_i32, %arg1, %c0_i32_0 : i32, i32, i32
  }
  func.func @transform_7(%arg0: i32, %arg1: i32) -> (i32, i32) {
    %c0_i32 = arith.constant 0 : i32
    %c0_i32_0 = arith.constant 0 : i32
    %c0_i32_1 = arith.constant 0 : i32
    return %c0_i32, %c0_i32_0 : i32, i32
  }
  func.func @transform_8(%arg0: i32, %arg1: i32) -> (i32, i32) {
    %c0_i32 = arith.constant 0 : i32
    %c0_i32_0 = arith.constant 0 : i32
    %c0_i32_1 = arith.constant 0 : i32
    return %c0_i32, %c0_i32_0 : i32, i32
  }
  func.func @transform_9(%arg0: i32, %arg1: i32) -> (i32, i32) {
    %c0_i32 = arith.constant 0 : i32
    %c0_i32_0 = arith.constant 0 : i32
    %c0_i32_1 = arith.constant 0 : i32
    return %c0_i32, %c0_i32_0 : i32, i32
  }
  func.func @transform_10(%arg0: i32, %arg1: i32) -> (i32, i32) {
    %c0_i32 = arith.constant 0 : i32
    %c0_i32_0 = arith.constant 0 : i32
    %c0_i32_1 = arith.constant 0 : i32
    return %c0_i32, %c0_i32_0 : i32, i32
  }
  func.func @transform_11(%arg0: i32, %arg1: i32) -> (i32, i32, i32) {
    %c0_i32 = arith.constant 0 : i32
    %c0_i32_0 = arith.constant 0 : i32
    return %arg0, %arg1, %c0_i32 : i32, i32, i32
  }
}

module attributes {stable_mosaic.version = 11 : i64} {
  func.func @_t5_adapter_kernel(%arg0: i32, %arg1: i32, %arg2: memref<1x8x32xf32, #tpu.memory_space<vmem>>, %arg3: memref<1x32xf32, #tpu.memory_space<vmem>>, %arg4: memref<32x32xbf16, #tpu.memory_space<vmem>>, %arg5: memref<32x32xbf16, #tpu.memory_space<vmem>>, %arg6: memref<32x32xbf16, #tpu.memory_space<vmem>>, %arg7: memref<32x32xbf16, #tpu.memory_space<vmem>>, %arg8: memref<4x8x8xbf16, #tpu.memory_space<vmem>>, %arg9: memref<32x16xbf16, #tpu.memory_space<vmem>>, %arg10: memref<1x16xf32, #tpu.memory_space<vmem>>, %arg11: memref<16x32xbf16, #tpu.memory_space<vmem>>, %arg12: memref<1x32xf32, #tpu.memory_space<vmem>>, %arg13: memref<1x8x32xf32, #tpu.memory_space<vmem>>, %arg14: memref<8x32xbf16, #tpu.memory_space<vmem>>, %arg15: memref<4x8x8xbf16, #tpu.memory_space<vmem>>, %arg16: memref<4x8x8xbf16, #tpu.memory_space<vmem>>, %arg17: memref<8x32xbf16, #tpu.memory_space<vmem>>) attributes {dimension_semantics = [#tpu.dimension_semantics<parallel>, #tpu.dimension_semantics<arbitrary>], iteration_bounds = array<i64: 2, 1>, scalar_prefetch = 0 : i64, scratch_operands = 4 : i64, tpu.core_type = #tpu.core_type<tc>, window_params = [{transform_indices = @transform_0, window_bounds = array<i64: 1, 8, 32>}, {pipeline_mode = #tpu.pipeline_mode<synchronous>, transform_indices = @transform_1, window_bounds = array<i64: 1, 32>}, {pipeline_mode = #tpu.pipeline_mode<synchronous>, transform_indices = @transform_2, window_bounds = array<i64: 32, 32>}, {pipeline_mode = #tpu.pipeline_mode<synchronous>, transform_indices = @transform_3, window_bounds = array<i64: 32, 32>}, {pipeline_mode = #tpu.pipeline_mode<synchronous>, transform_indices = @transform_4, window_bounds = array<i64: 32, 32>}, {pipeline_mode = #tpu.pipeline_mode<synchronous>, transform_indices = @transform_5, window_bounds = array<i64: 32, 32>}, {transform_indices = @transform_6, window_bounds = array<i64: 4, 8, 8>}, {pipeline_mode = #tpu.pipeline_mode<synchronous>, transform_indices = @transform_7, window_bounds = array<i64: 32, 16>}, {pipeline_mode = #tpu.pipeline_mode<synchronous>, transform_indices = @transform_8, window_bounds = array<i64: 1, 16>}, {pipeline_mode = #tpu.pipeline_mode<synchronous>, transform_indices = @transform_9, window_bounds = array<i64: 16, 32>}, {pipeline_mode = #tpu.pipeline_mode<synchronous>, transform_indices = @transform_10, window_bounds = array<i64: 1, 32>}, {transform_indices = @transform_11, window_bounds = array<i64: 1, 8, 32>}]} {
    %c0_i32 = arith.constant 0 : i32
    %0 = arith.cmpi eq, %arg1, %c0_i32 : i32
    %1 = arith.extui %0 : i1 to i32
    %c0_i32_0 = arith.constant 0 : i32
    %2 = arith.cmpi ne, %1, %c0_i32_0 : i32
    scf.if %2 {
      %c0_78 = arith.constant 0 : index
      %c0_79 = arith.constant 0 : index
      %c0_80 = arith.constant 0 : index
      %138 = vector.load %arg2[%c0_78, %c0_79, %c0_80] : memref<1x8x32xf32, #tpu.memory_space<vmem>>, vector<1x8x32xf32>
      %139 = vector.shape_cast %138 : vector<1x8x32xf32> to vector<8x32xf32>
      %140 = arith.mulf %139, %139 : vector<8x32xf32>
      %cst_81 = arith.constant dense<0.000000e+00> : vector<8xf32>
      %141 = vector.multi_reduction <add>, %140, %cst_81 [1] : vector<8x32xf32> to vector<8xf32>
      %142 = vector.shape_cast %141 : vector<8xf32> to vector<8x1xf32>
      %cst_82 = arith.constant 3.200000e+01 : f32
      %143 = vector.broadcast %cst_82 : f32 to vector<8x1xf32>
      %144 = arith.divf %142, %143 : vector<8x1xf32>
      %cst_83 = arith.constant 9.99999997E-7 : f32
      %145 = vector.broadcast %cst_83 : f32 to vector<8x1xf32>
      %146 = arith.addf %144, %145 : vector<8x1xf32>
      %147 = math.rsqrt %146 : vector<8x1xf32>
      %148 = vector.broadcast %147 : vector<8x1xf32> to vector<8x32xf32>
      %149 = arith.mulf %139, %148 : vector<8x32xf32>
      %c0_84 = arith.constant 0 : index
      %c0_85 = arith.constant 0 : index
      %150 = vector.load %arg3[%c0_84, %c0_85] : memref<1x32xf32, #tpu.memory_space<vmem>>, vector<1x32xf32>
      %151 = vector.shape_cast %150 : vector<1x32xf32> to vector<32xf32>
      %152 = vector.shape_cast %151 : vector<32xf32> to vector<1x32xf32>
      %153 = vector.broadcast %152 : vector<1x32xf32> to vector<8x32xf32>
      %154 = arith.mulf %149, %153 : vector<8x32xf32>
      %155 = arith.truncf %154 : vector<8x32xf32> to vector<8x32xbf16>
      %c0_86 = arith.constant 0 : index
      %c0_87 = arith.constant 0 : index
      %156 = vector.load %arg14[%c0_86, %c0_87] : memref<8x32xbf16, #tpu.memory_space<vmem>>, vector<8x32xbf16>
      tpu.vector_store %arg14[%c0_86, %c0_87], %155 {strides = array<i32>} : memref<8x32xbf16, #tpu.memory_space<vmem>>, vector<8x32xbf16>,
      %c0_88 = arith.constant 0 : index
      %c0_89 = arith.constant 0 : index
      %157 = vector.load %arg5[%c0_88, %c0_89] : memref<32x32xbf16, #tpu.memory_space<vmem>>, vector<32x32xbf16>
      %cst_90 = arith.constant dense<0.000000e+00> : vector<8x32xf32>
      %158 = tpu.matmul %155, %157, %cst_90 {dimension_numbers = #tpu.dot_dimension_numbers<[1], [0], [0], [1], [0, 0, 1, 1], [], []>} : vector<8x32xbf16>, vector<32x32xbf16>, vector<8x32xf32> -> vector<8x32xf32>
      %159 = arith.truncf %158 : vector<8x32xf32> to vector<8x32xbf16>
      %c0_91 = arith.constant 0 : index
      %c0_92 = arith.constant 0 : index
      %160 = vector.load %arg6[%c0_91, %c0_92] : memref<32x32xbf16, #tpu.memory_space<vmem>>, vector<32x32xbf16>
      %cst_93 = arith.constant dense<0.000000e+00> : vector<8x32xf32>
      %161 = tpu.matmul %155, %160, %cst_93 {dimension_numbers = #tpu.dot_dimension_numbers<[1], [0], [0], [1], [0, 0, 1, 1], [], []>} : vector<8x32xbf16>, vector<32x32xbf16>, vector<8x32xf32> -> vector<8x32xf32>
      %162 = arith.truncf %161 : vector<8x32xf32> to vector<8x32xbf16>
      %163 = vector.extract_strided_slice %159 {offsets = [0, 0], sizes = [8, 8], strides = [1, 1]} : vector<8x32xbf16> to vector<8x8xbf16>
      %164 = tpu.transpose %163, [1, 0] : vector<8x8xbf16> -> vector<8x8xbf16>
      %c0_94 = arith.constant 0 : index
      %c0_95 = arith.constant 0 : index
      %c0_96 = arith.constant 0 : index
      %165 = vector.load %arg15[%c0_94, %c0_95, %c0_96] : memref<4x8x8xbf16, #tpu.memory_space<vmem>>, vector<1x8x8xbf16>
      %166 = vector.shape_cast %165 : vector<1x8x8xbf16> to vector<8x8xbf16>
      %167 = vector.shape_cast %164 : vector<8x8xbf16> to vector<1x8x8xbf16>
      tpu.vector_store %arg15[%c0_94, %c0_95, %c0_96], %167 {strides = array<i32>} : memref<4x8x8xbf16, #tpu.memory_space<vmem>>, vector<1x8x8xbf16>,
      %168 = vector.extract_strided_slice %162 {offsets = [0, 0], sizes = [8, 8], strides = [1, 1]} : vector<8x32xbf16> to vector<8x8xbf16>
      %c0_97 = arith.constant 0 : index
      %c0_98 = arith.constant 0 : index
      %c0_99 = arith.constant 0 : index
      %169 = vector.load %arg16[%c0_97, %c0_98, %c0_99] : memref<4x8x8xbf16, #tpu.memory_space<vmem>>, vector<1x8x8xbf16>
      %170 = vector.shape_cast %169 : vector<1x8x8xbf16> to vector<8x8xbf16>
      %171 = vector.shape_cast %168 : vector<8x8xbf16> to vector<1x8x8xbf16>
      tpu.vector_store %arg16[%c0_97, %c0_98, %c0_99], %171 {strides = array<i32>} : memref<4x8x8xbf16, #tpu.memory_space<vmem>>, vector<1x8x8xbf16>,
      %172 = vector.extract_strided_slice %159 {offsets = [0, 8], sizes = [8, 8], strides = [1, 1]} : vector<8x32xbf16> to vector<8x8xbf16>
      %173 = tpu.transpose %172, [1, 0] : vector<8x8xbf16> -> vector<8x8xbf16>
      %c1_100 = arith.constant 1 : index
      %c0_101 = arith.constant 0 : index
      %c0_102 = arith.constant 0 : index
      %174 = vector.load %arg15[%c1_100, %c0_101, %c0_102] : memref<4x8x8xbf16, #tpu.memory_space<vmem>>, vector<1x8x8xbf16>
      %175 = vector.shape_cast %174 : vector<1x8x8xbf16> to vector<8x8xbf16>
      %176 = vector.shape_cast %173 : vector<8x8xbf16> to vector<1x8x8xbf16>
      tpu.vector_store %arg15[%c1_100, %c0_101, %c0_102], %176 {strides = array<i32>} : memref<4x8x8xbf16, #tpu.memory_space<vmem>>, vector<1x8x8xbf16>,
      %177 = vector.extract_strided_slice %162 {offsets = [0, 8], sizes = [8, 8], strides = [1, 1]} : vector<8x32xbf16> to vector<8x8xbf16>
      %c1_103 = arith.constant 1 : index
      %c0_104 = arith.constant 0 : index
      %c0_105 = arith.constant 0 : index
      %178 = vector.load %arg16[%c1_103, %c0_104, %c0_105] : memref<4x8x8xbf16, #tpu.memory_space<vmem>>, vector<1x8x8xbf16>
      %179 = vector.shape_cast %178 : vector<1x8x8xbf16> to vector<8x8xbf16>
      %180 = vector.shape_cast %177 : vector<8x8xbf16> to vector<1x8x8xbf16>
      tpu.vector_store %arg16[%c1_103, %c0_104, %c0_105], %180 {strides = array<i32>} : memref<4x8x8xbf16, #tpu.memory_space<vmem>>, vector<1x8x8xbf16>,
      %181 = vector.extract_strided_slice %159 {offsets = [0, 16], sizes = [8, 8], strides = [1, 1]} : vector<8x32xbf16> to vector<8x8xbf16>
      %182 = tpu.transpose %181, [1, 0] : vector<8x8xbf16> -> vector<8x8xbf16>
      %c2_106 = arith.constant 2 : index
      %c0_107 = arith.constant 0 : index
      %c0_108 = arith.constant 0 : index
      %183 = vector.load %arg15[%c2_106, %c0_107, %c0_108] : memref<4x8x8xbf16, #tpu.memory_space<vmem>>, vector<1x8x8xbf16>
      %184 = vector.shape_cast %183 : vector<1x8x8xbf16> to vector<8x8xbf16>
      %185 = vector.shape_cast %182 : vector<8x8xbf16> to vector<1x8x8xbf16>
      tpu.vector_store %arg15[%c2_106, %c0_107, %c0_108], %185 {strides = array<i32>} : memref<4x8x8xbf16, #tpu.memory_space<vmem>>, vector<1x8x8xbf16>,
      %186 = vector.extract_strided_slice %162 {offsets = [0, 16], sizes = [8, 8], strides = [1, 1]} : vector<8x32xbf16> to vector<8x8xbf16>
      %c2_109 = arith.constant 2 : index
      %c0_110 = arith.constant 0 : index
      %c0_111 = arith.constant 0 : index
      %187 = vector.load %arg16[%c2_109, %c0_110, %c0_111] : memref<4x8x8xbf16, #tpu.memory_space<vmem>>, vector<1x8x8xbf16>
      %188 = vector.shape_cast %187 : vector<1x8x8xbf16> to vector<8x8xbf16>
      %189 = vector.shape_cast %186 : vector<8x8xbf16> to vector<1x8x8xbf16>
      tpu.vector_store %arg16[%c2_109, %c0_110, %c0_111], %189 {strides = array<i32>} : memref<4x8x8xbf16, #tpu.memory_space<vmem>>, vector<1x8x8xbf16>,
      %190 = vector.extract_strided_slice %159 {offsets = [0, 24], sizes = [8, 8], strides = [1, 1]} : vector<8x32xbf16> to vector<8x8xbf16>
      %191 = tpu.transpose %190, [1, 0] : vector<8x8xbf16> -> vector<8x8xbf16>
      %c3_112 = arith.constant 3 : index
      %c0_113 = arith.constant 0 : index
      %c0_114 = arith.constant 0 : index
      %192 = vector.load %arg15[%c3_112, %c0_113, %c0_114] : memref<4x8x8xbf16, #tpu.memory_space<vmem>>, vector<1x8x8xbf16>
      %193 = vector.shape_cast %192 : vector<1x8x8xbf16> to vector<8x8xbf16>
      %194 = vector.shape_cast %191 : vector<8x8xbf16> to vector<1x8x8xbf16>
      tpu.vector_store %arg15[%c3_112, %c0_113, %c0_114], %194 {strides = array<i32>} : memref<4x8x8xbf16, #tpu.memory_space<vmem>>, vector<1x8x8xbf16>,
      %195 = vector.extract_strided_slice %162 {offsets = [0, 24], sizes = [8, 8], strides = [1, 1]} : vector<8x32xbf16> to vector<8x8xbf16>
      %c3_115 = arith.constant 3 : index
      %c0_116 = arith.constant 0 : index
      %c0_117 = arith.constant 0 : index
      %196 = vector.load %arg16[%c3_115, %c0_116, %c0_117] : memref<4x8x8xbf16, #tpu.memory_space<vmem>>, vector<1x8x8xbf16>
      %197 = vector.shape_cast %196 : vector<1x8x8xbf16> to vector<8x8xbf16>
      %198 = vector.shape_cast %195 : vector<8x8xbf16> to vector<1x8x8xbf16>
      tpu.vector_store %arg16[%c3_115, %c0_116, %c0_117], %198 {strides = array<i32>} : memref<4x8x8xbf16, #tpu.memory_space<vmem>>, vector<1x8x8xbf16>,
    } else {
    }
    %c8_i32 = arith.constant 8 : i32
    %3 = arith.muli %arg1, %c8_i32 : i32
    %4 = tpu.assume_multiple %3, 8 : i32
    %c0 = arith.constant 0 : index
    %5 = arith.index_cast %4 : i32 to index
    %c0_1 = arith.constant 0 : index
    %6 = vector.load %arg2[%c0, %5, %c0_1] : memref<1x8x32xf32, #tpu.memory_space<vmem>>, vector<1x8x32xf32>
    %7 = vector.shape_cast %6 : vector<1x8x32xf32> to vector<8x32xf32>
    %8 = arith.index_cast %4 : i32 to index
    %c0_2 = arith.constant 0 : index
    %9 = vector.load %arg14[%8, %c0_2] : memref<8x32xbf16, #tpu.memory_space<vmem>>, vector<8x32xbf16>
    %c0_3 = arith.constant 0 : index
    %c0_4 = arith.constant 0 : index
    %10 = vector.load %arg4[%c0_3, %c0_4] : memref<32x32xbf16, #tpu.memory_space<vmem>>, vector<32x32xbf16>
    %cst = arith.constant dense<0.000000e+00> : vector<8x32xf32>
    %11 = tpu.matmul %9, %10, %cst {dimension_numbers = #tpu.dot_dimension_numbers<[1], [0], [0], [1], [0, 0, 1, 1], [], []>} : vector<8x32xbf16>, vector<32x32xbf16>, vector<8x32xf32> -> vector<8x32xf32>
    %12 = vector.extract_strided_slice %11 {offsets = [0, 0], sizes = [8, 8], strides = [1, 1]} : vector<8x32xf32> to vector<8x8xf32>
    %13 = arith.truncf %12 : vector<8x8xf32> to vector<8x8xbf16>
    %c0_5 = arith.constant 0 : index
    %c0_6 = arith.constant 0 : index
    %c0_7 = arith.constant 0 : index
    %14 = vector.load %arg15[%c0_5, %c0_6, %c0_7] : memref<4x8x8xbf16, #tpu.memory_space<vmem>>, vector<1x8x8xbf16>
    %15 = vector.shape_cast %14 : vector<1x8x8xbf16> to vector<8x8xbf16>
    %cst_8 = arith.constant dense<0.000000e+00> : vector<8x8xf32>
    %16 = tpu.matmul %13, %15, %cst_8 {dimension_numbers = #tpu.dot_dimension_numbers<[1], [0], [0], [1], [0, 0, 1, 1], [], []>} : vector<8x8xbf16>, vector<8x8xbf16>, vector<8x8xf32> -> vector<8x8xf32>
    %c0_9 = arith.constant 0 : index
    %c0_10 = arith.constant 0 : index
    %c0_11 = arith.constant 0 : index
    %17 = vector.load %arg8[%c0_9, %c0_10, %c0_11] : memref<4x8x8xbf16, #tpu.memory_space<vmem>>, vector<1x8x8xbf16>
    %18 = vector.shape_cast %17 : vector<1x8x8xbf16> to vector<8x8xbf16>
    %19 = arith.extf %18 : vector<8x8xbf16> to vector<8x8xf32>
    %20 = arith.addf %16, %19 : vector<8x8xf32>
    %cst_12 = arith.constant dense<0xFF800000> : vector<8xf32>
    %21 = vector.multi_reduction <maximumf>, %20, %cst_12 [1] : vector<8x8xf32> to vector<8xf32>
    %22 = vector.shape_cast %21 : vector<8xf32> to vector<8x1xf32>
    %23 = vector.broadcast %22 : vector<8x1xf32> to vector<8x8xf32>
    %24 = arith.subf %20, %23 : vector<8x8xf32>
    %25 = math.exp %24 : vector<8x8xf32>
    %cst_13 = arith.constant dense<0.000000e+00> : vector<8xf32>
    %26 = vector.multi_reduction <add>, %25, %cst_13 [1] : vector<8x8xf32> to vector<8xf32>
    %27 = vector.shape_cast %26 : vector<8xf32> to vector<8x1xf32>
    %28 = tpu.reciprocal %27 {approx = true} : vector<8x1xf32> -> vector<8x1xf32>
    %29 = vector.broadcast %28 : vector<8x1xf32> to vector<8x8xf32>
    %30 = arith.mulf %25, %29 : vector<8x8xf32>
    %31 = arith.truncf %30 : vector<8x8xf32> to vector<8x8xbf16>
    %c0_14 = arith.constant 0 : index
    %c0_15 = arith.constant 0 : index
    %c0_16 = arith.constant 0 : index
    %32 = vector.load %arg16[%c0_14, %c0_15, %c0_16] : memref<4x8x8xbf16, #tpu.memory_space<vmem>>, vector<1x8x8xbf16>
    %33 = vector.shape_cast %32 : vector<1x8x8xbf16> to vector<8x8xbf16>
    %cst_17 = arith.constant dense<0.000000e+00> : vector<8x8xf32>
    %34 = tpu.matmul %31, %33, %cst_17 {dimension_numbers = #tpu.dot_dimension_numbers<[1], [0], [0], [1], [0, 0, 1, 1], [], []>} : vector<8x8xbf16>, vector<8x8xbf16>, vector<8x8xf32> -> vector<8x8xf32>
    %35 = arith.truncf %34 : vector<8x8xf32> to vector<8x8xbf16>
    %c0_18 = arith.constant 0 : index
    %c0_19 = arith.constant 0 : index
    %36 = vector.load %arg17[%c0_18, %c0_19] : memref<8x32xbf16, #tpu.memory_space<vmem>>, vector<8x8xbf16>
    tpu.vector_store %arg17[%c0_18, %c0_19], %35 {strides = array<i32>} : memref<8x32xbf16, #tpu.memory_space<vmem>>, vector<8x8xbf16>,
    %37 = vector.extract_strided_slice %11 {offsets = [0, 8], sizes = [8, 8], strides = [1, 1]} : vector<8x32xf32> to vector<8x8xf32>
    %38 = arith.truncf %37 : vector<8x8xf32> to vector<8x8xbf16>
    %c1 = arith.constant 1 : index
    %c0_20 = arith.constant 0 : index
    %c0_21 = arith.constant 0 : index
    %39 = vector.load %arg15[%c1, %c0_20, %c0_21] : memref<4x8x8xbf16, #tpu.memory_space<vmem>>, vector<1x8x8xbf16>
    %40 = vector.shape_cast %39 : vector<1x8x8xbf16> to vector<8x8xbf16>
    %cst_22 = arith.constant dense<0.000000e+00> : vector<8x8xf32>
    %41 = tpu.matmul %38, %40, %cst_22 {dimension_numbers = #tpu.dot_dimension_numbers<[1], [0], [0], [1], [0, 0, 1, 1], [], []>} : vector<8x8xbf16>, vector<8x8xbf16>, vector<8x8xf32> -> vector<8x8xf32>
    %c1_23 = arith.constant 1 : index
    %c0_24 = arith.constant 0 : index
    %c0_25 = arith.constant 0 : index
    %42 = vector.load %arg8[%c1_23, %c0_24, %c0_25] : memref<4x8x8xbf16, #tpu.memory_space<vmem>>, vector<1x8x8xbf16>
    %43 = vector.shape_cast %42 : vector<1x8x8xbf16> to vector<8x8xbf16>
    %44 = arith.extf %43 : vector<8x8xbf16> to vector<8x8xf32>
    %45 = arith.addf %41, %44 : vector<8x8xf32>
    %cst_26 = arith.constant dense<0xFF800000> : vector<8xf32>
    %46 = vector.multi_reduction <maximumf>, %45, %cst_26 [1] : vector<8x8xf32> to vector<8xf32>
    %47 = vector.shape_cast %46 : vector<8xf32> to vector<8x1xf32>
    %48 = vector.broadcast %47 : vector<8x1xf32> to vector<8x8xf32>
    %49 = arith.subf %45, %48 : vector<8x8xf32>
    %50 = math.exp %49 : vector<8x8xf32>
    %cst_27 = arith.constant dense<0.000000e+00> : vector<8xf32>
    %51 = vector.multi_reduction <add>, %50, %cst_27 [1] : vector<8x8xf32> to vector<8xf32>
    %52 = vector.shape_cast %51 : vector<8xf32> to vector<8x1xf32>
    %53 = tpu.reciprocal %52 {approx = true} : vector<8x1xf32> -> vector<8x1xf32>
    %54 = vector.broadcast %53 : vector<8x1xf32> to vector<8x8xf32>
    %55 = arith.mulf %50, %54 : vector<8x8xf32>
    %56 = arith.truncf %55 : vector<8x8xf32> to vector<8x8xbf16>
    %c1_28 = arith.constant 1 : index
    %c0_29 = arith.constant 0 : index
    %c0_30 = arith.constant 0 : index
    %57 = vector.load %arg16[%c1_28, %c0_29, %c0_30] : memref<4x8x8xbf16, #tpu.memory_space<vmem>>, vector<1x8x8xbf16>
    %58 = vector.shape_cast %57 : vector<1x8x8xbf16> to vector<8x8xbf16>
    %cst_31 = arith.constant dense<0.000000e+00> : vector<8x8xf32>
    %59 = tpu.matmul %56, %58, %cst_31 {dimension_numbers = #tpu.dot_dimension_numbers<[1], [0], [0], [1], [0, 0, 1, 1], [], []>} : vector<8x8xbf16>, vector<8x8xbf16>, vector<8x8xf32> -> vector<8x8xf32>
    %60 = arith.truncf %59 : vector<8x8xf32> to vector<8x8xbf16>
    %c0_32 = arith.constant 0 : index
    %c8 = arith.constant 8 : index
    %61 = vector.load %arg17[%c0_32, %c8] : memref<8x32xbf16, #tpu.memory_space<vmem>>, vector<8x8xbf16>
    tpu.vector_store %arg17[%c0_32, %c8], %60 {strides = array<i32>} : memref<8x32xbf16, #tpu.memory_space<vmem>>, vector<8x8xbf16>,
    %62 = vector.extract_strided_slice %11 {offsets = [0, 16], sizes = [8, 8], strides = [1, 1]} : vector<8x32xf32> to vector<8x8xf32>
    %63 = arith.truncf %62 : vector<8x8xf32> to vector<8x8xbf16>
    %c2 = arith.constant 2 : index
    %c0_33 = arith.constant 0 : index
    %c0_34 = arith.constant 0 : index
    %64 = vector.load %arg15[%c2, %c0_33, %c0_34] : memref<4x8x8xbf16, #tpu.memory_space<vmem>>, vector<1x8x8xbf16>
    %65 = vector.shape_cast %64 : vector<1x8x8xbf16> to vector<8x8xbf16>
    %cst_35 = arith.constant dense<0.000000e+00> : vector<8x8xf32>
    %66 = tpu.matmul %63, %65, %cst_35 {dimension_numbers = #tpu.dot_dimension_numbers<[1], [0], [0], [1], [0, 0, 1, 1], [], []>} : vector<8x8xbf16>, vector<8x8xbf16>, vector<8x8xf32> -> vector<8x8xf32>
    %c2_36 = arith.constant 2 : index
    %c0_37 = arith.constant 0 : index
    %c0_38 = arith.constant 0 : index
    %67 = vector.load %arg8[%c2_36, %c0_37, %c0_38] : memref<4x8x8xbf16, #tpu.memory_space<vmem>>, vector<1x8x8xbf16>
    %68 = vector.shape_cast %67 : vector<1x8x8xbf16> to vector<8x8xbf16>
    %69 = arith.extf %68 : vector<8x8xbf16> to vector<8x8xf32>
    %70 = arith.addf %66, %69 : vector<8x8xf32>
    %cst_39 = arith.constant dense<0xFF800000> : vector<8xf32>
    %71 = vector.multi_reduction <maximumf>, %70, %cst_39 [1] : vector<8x8xf32> to vector<8xf32>
    %72 = vector.shape_cast %71 : vector<8xf32> to vector<8x1xf32>
    %73 = vector.broadcast %72 : vector<8x1xf32> to vector<8x8xf32>
    %74 = arith.subf %70, %73 : vector<8x8xf32>
    %75 = math.exp %74 : vector<8x8xf32>
    %cst_40 = arith.constant dense<0.000000e+00> : vector<8xf32>
    %76 = vector.multi_reduction <add>, %75, %cst_40 [1] : vector<8x8xf32> to vector<8xf32>
    %77 = vector.shape_cast %76 : vector<8xf32> to vector<8x1xf32>
    %78 = tpu.reciprocal %77 {approx = true} : vector<8x1xf32> -> vector<8x1xf32>
    %79 = vector.broadcast %78 : vector<8x1xf32> to vector<8x8xf32>
    %80 = arith.mulf %75, %79 : vector<8x8xf32>
    %81 = arith.truncf %80 : vector<8x8xf32> to vector<8x8xbf16>
    %c2_41 = arith.constant 2 : index
    %c0_42 = arith.constant 0 : index
    %c0_43 = arith.constant 0 : index
    %82 = vector.load %arg16[%c2_41, %c0_42, %c0_43] : memref<4x8x8xbf16, #tpu.memory_space<vmem>>, vector<1x8x8xbf16>
    %83 = vector.shape_cast %82 : vector<1x8x8xbf16> to vector<8x8xbf16>
    %cst_44 = arith.constant dense<0.000000e+00> : vector<8x8xf32>
    %84 = tpu.matmul %81, %83, %cst_44 {dimension_numbers = #tpu.dot_dimension_numbers<[1], [0], [0], [1], [0, 0, 1, 1], [], []>} : vector<8x8xbf16>, vector<8x8xbf16>, vector<8x8xf32> -> vector<8x8xf32>
    %85 = arith.truncf %84 : vector<8x8xf32> to vector<8x8xbf16>
    %c0_45 = arith.constant 0 : index
    %c16 = arith.constant 16 : index
    %86 = vector.load %arg17[%c0_45, %c16] : memref<8x32xbf16, #tpu.memory_space<vmem>>, vector<8x8xbf16>
    tpu.vector_store %arg17[%c0_45, %c16], %85 {strides = array<i32>} : memref<8x32xbf16, #tpu.memory_space<vmem>>, vector<8x8xbf16>,
    %87 = vector.extract_strided_slice %11 {offsets = [0, 24], sizes = [8, 8], strides = [1, 1]} : vector<8x32xf32> to vector<8x8xf32>
    %88 = arith.truncf %87 : vector<8x8xf32> to vector<8x8xbf16>
    %c3 = arith.constant 3 : index
    %c0_46 = arith.constant 0 : index
    %c0_47 = arith.constant 0 : index
    %89 = vector.load %arg15[%c3, %c0_46, %c0_47] : memref<4x8x8xbf16, #tpu.memory_space<vmem>>, vector<1x8x8xbf16>
    %90 = vector.shape_cast %89 : vector<1x8x8xbf16> to vector<8x8xbf16>
    %cst_48 = arith.constant dense<0.000000e+00> : vector<8x8xf32>
    %91 = tpu.matmul %88, %90, %cst_48 {dimension_numbers = #tpu.dot_dimension_numbers<[1], [0], [0], [1], [0, 0, 1, 1], [], []>} : vector<8x8xbf16>, vector<8x8xbf16>, vector<8x8xf32> -> vector<8x8xf32>
    %c3_49 = arith.constant 3 : index
    %c0_50 = arith.constant 0 : index
    %c0_51 = arith.constant 0 : index
    %92 = vector.load %arg8[%c3_49, %c0_50, %c0_51] : memref<4x8x8xbf16, #tpu.memory_space<vmem>>, vector<1x8x8xbf16>
    %93 = vector.shape_cast %92 : vector<1x8x8xbf16> to vector<8x8xbf16>
    %94 = arith.extf %93 : vector<8x8xbf16> to vector<8x8xf32>
    %95 = arith.addf %91, %94 : vector<8x8xf32>
    %cst_52 = arith.constant dense<0xFF800000> : vector<8xf32>
    %96 = vector.multi_reduction <maximumf>, %95, %cst_52 [1] : vector<8x8xf32> to vector<8xf32>
    %97 = vector.shape_cast %96 : vector<8xf32> to vector<8x1xf32>
    %98 = vector.broadcast %97 : vector<8x1xf32> to vector<8x8xf32>
    %99 = arith.subf %95, %98 : vector<8x8xf32>
    %100 = math.exp %99 : vector<8x8xf32>
    %cst_53 = arith.constant dense<0.000000e+00> : vector<8xf32>
    %101 = vector.multi_reduction <add>, %100, %cst_53 [1] : vector<8x8xf32> to vector<8xf32>
    %102 = vector.shape_cast %101 : vector<8xf32> to vector<8x1xf32>
    %103 = tpu.reciprocal %102 {approx = true} : vector<8x1xf32> -> vector<8x1xf32>
    %104 = vector.broadcast %103 : vector<8x1xf32> to vector<8x8xf32>
    %105 = arith.mulf %100, %104 : vector<8x8xf32>
    %106 = arith.truncf %105 : vector<8x8xf32> to vector<8x8xbf16>
    %c3_54 = arith.constant 3 : index
    %c0_55 = arith.constant 0 : index
    %c0_56 = arith.constant 0 : index
    %107 = vector.load %arg16[%c3_54, %c0_55, %c0_56] : memref<4x8x8xbf16, #tpu.memory_space<vmem>>, vector<1x8x8xbf16>
    %108 = vector.shape_cast %107 : vector<1x8x8xbf16> to vector<8x8xbf16>
    %cst_57 = arith.constant dense<0.000000e+00> : vector<8x8xf32>
    %109 = tpu.matmul %106, %108, %cst_57 {dimension_numbers = #tpu.dot_dimension_numbers<[1], [0], [0], [1], [0, 0, 1, 1], [], []>} : vector<8x8xbf16>, vector<8x8xbf16>, vector<8x8xf32> -> vector<8x8xf32>
    %110 = arith.truncf %109 : vector<8x8xf32> to vector<8x8xbf16>
    %c0_58 = arith.constant 0 : index
    %c24 = arith.constant 24 : index
    %111 = vector.load %arg17[%c0_58, %c24] : memref<8x32xbf16, #tpu.memory_space<vmem>>, vector<8x8xbf16>
    tpu.vector_store %arg17[%c0_58, %c24], %110 {strides = array<i32>} : memref<8x32xbf16, #tpu.memory_space<vmem>>, vector<8x8xbf16>,
    %c0_59 = arith.constant 0 : index
    %c0_60 = arith.constant 0 : index
    %112 = vector.load %arg17[%c0_59, %c0_60] : memref<8x32xbf16, #tpu.memory_space<vmem>>, vector<8x32xbf16>
    %c0_61 = arith.constant 0 : index
    %c0_62 = arith.constant 0 : index
    %113 = vector.load %arg7[%c0_61, %c0_62] : memref<32x32xbf16, #tpu.memory_space<vmem>>, vector<32x32xbf16>
    %cst_63 = arith.constant dense<0.000000e+00> : vector<8x32xf32>
    %114 = tpu.matmul %112, %113, %cst_63 {dimension_numbers = #tpu.dot_dimension_numbers<[1], [0], [0], [1], [0, 0, 1, 1], [], []>} : vector<8x32xbf16>, vector<32x32xbf16>, vector<8x32xf32> -> vector<8x32xf32>
    %115 = arith.truncf %114 : vector<8x32xf32> to vector<8x32xbf16>
    %c0_64 = arith.constant 0 : index
    %c0_65 = arith.constant 0 : index
    %116 = vector.load %arg9[%c0_64, %c0_65] : memref<32x16xbf16, #tpu.memory_space<vmem>>, vector<32x16xbf16>
    %cst_66 = arith.constant dense<0.000000e+00> : vector<8x16xf32>
    %117 = tpu.matmul %115, %116, %cst_66 {dimension_numbers = #tpu.dot_dimension_numbers<[1], [0], [0], [1], [0, 0, 1, 1], [], []>} : vector<8x32xbf16>, vector<32x16xbf16>, vector<8x16xf32> -> vector<8x16xf32>
    %c0_67 = arith.constant 0 : index
    %c0_68 = arith.constant 0 : index
    %118 = vector.load %arg10[%c0_67, %c0_68] : memref<1x16xf32, #tpu.memory_space<vmem>>, vector<1x16xf32>
    %119 = vector.shape_cast %118 : vector<1x16xf32> to vector<16xf32>
    %120 = vector.shape_cast %119 : vector<16xf32> to vector<1x16xf32>
    %121 = vector.broadcast %120 : vector<1x16xf32> to vector<8x16xf32>
    %122 = arith.addf %117, %121 : vector<8x16xf32>
    %cst_69 = arith.constant 0.000000e+00 : f32
    %123 = vector.broadcast %cst_69 : f32 to vector<8x16xf32>
    %124 = arith.maximumf %122, %123 : vector<8x16xf32>
    %125 = arith.truncf %124 : vector<8x16xf32> to vector<8x16xbf16>
    %c0_70 = arith.constant 0 : index
    %c0_71 = arith.constant 0 : index
    %126 = vector.load %arg11[%c0_70, %c0_71] : memref<16x32xbf16, #tpu.memory_space<vmem>>, vector<16x32xbf16>
    %cst_72 = arith.constant dense<0.000000e+00> : vector<8x32xf32>
    %127 = tpu.matmul %125, %126, %cst_72 {dimension_numbers = #tpu.dot_dimension_numbers<[1], [0], [0], [1], [0, 0, 1, 1], [], []>} : vector<8x16xbf16>, vector<16x32xbf16>, vector<8x32xf32> -> vector<8x32xf32>
    %c0_73 = arith.constant 0 : index
    %c0_74 = arith.constant 0 : index
    %128 = vector.load %arg12[%c0_73, %c0_74] : memref<1x32xf32, #tpu.memory_space<vmem>>, vector<1x32xf32>
    %129 = vector.shape_cast %128 : vector<1x32xf32> to vector<32xf32>
    %130 = vector.shape_cast %129 : vector<32xf32> to vector<1x32xf32>
    %131 = vector.broadcast %130 : vector<1x32xf32> to vector<8x32xf32>
    %132 = arith.addf %127, %131 : vector<8x32xf32>
    %133 = arith.addf %132, %114 : vector<8x32xf32>
    %134 = arith.addf %133, %7 : vector<8x32xf32>
    %c0_75 = arith.constant 0 : index
    %c0_76 = arith.constant 0 : index
    %c0_77 = arith.constant 0 : index
    %135 = vector.load %arg13[%c0_75, %c0_76, %c0_77] : memref<1x8x32xf32, #tpu.memory_space<vmem>>, vector<1x8x32xf32>
    %136 = vector.shape_cast %135 : vector<1x8x32xf32> to vector<8x32xf32>
    %137 = vector.shape_cast %134 : vector<8x32xf32> to vector<1x8x32xf32>
    tpu.vector_store %arg13[%c0_75, %c0_76, %c0_77], %137 {strides = array<i32>} : memref<1x8x32xf32, #tpu.memory_space<vmem>>, vector<1x8x32xf32>,
    return
  }
  func.func @transform_0(%arg0: i32, %arg1: i32) -> (i32, i32, i32) {
    %c0_i32 = arith.constant 0 : i32
    %c0_i32_0 = arith.constant 0 : i32
    %c0_i32_1 = arith.constant 0 : i32
    return %arg0, %c0_i32, %c0_i32_0 : i32, i32, i32
  }
  func.func @transform_1(%arg0: i32, %arg1: i32) -> (i32, i32) {
    %c0_i32 = arith.constant 0 : i32
    %c0_i32_0 = arith.constant 0 : i32
    %c0_i32_1 = arith.constant 0 : i32
    return %c0_i32, %c0_i32_0 : i32, i32
  }
  func.func @transform_2(%arg0: i32, %arg1: i32) -> (i32, i32) {
    %c0_i32 = arith.constant 0 : i32
    %c0_i32_0 = arith.constant 0 : i32
    %c0_i32_1 = arith.constant 0 : i32
    return %c0_i32, %c0_i32_0 : i32, i32
  }
  func.func @transform_3(%arg0: i32, %arg1: i32) -> (i32, i32) {
    %c0_i32 = arith.constant 0 : i32
    %c0_i32_0 = arith.constant 0 : i32
    %c0_i32_1 = arith.constant 0 : i32
    return %c0_i32, %c0_i32_0 : i32, i32
  }
  func.func @transform_4(%arg0: i32, %arg1: i32) -> (i32, i32) {
    %c0_i32 = arith.constant 0 : i32
    %c0_i32_0 = arith.constant 0 : i32
    %c0_i32_1 = arith.constant 0 : i32
    return %c0_i32, %c0_i32_0 : i32, i32
  }
  func.func @transform_5(%arg0: i32, %arg1: i32) -> (i32, i32) {
    %c0_i32 = arith.constant 0 : i32
    %c0_i32_0 = arith.constant 0 : i32
    %c0_i32_1 = arith.constant 0 : i32
    return %c0_i32, %c0_i32_0 : i32, i32
  }
  func.func @transform_6(%arg0: i32, %arg1: i32) -> (i32, i32, i32) {
    %c0_i32 = arith.constant 0 : i32
    %c0_i32_0 = arith.constant 0 : i32
    %c0_i32_1 = arith.constant 0 : i32
    return %c0_i32, %arg1, %c0_i32_0 : i32, i32, i32
  }
  func.func @transform_7(%arg0: i32, %arg1: i32) -> (i32, i32) {
    %c0_i32 = arith.constant 0 : i32
    %c0_i32_0 = arith.constant 0 : i32
    %c0_i32_1 = arith.constant 0 : i32
    return %c0_i32, %c0_i32_0 : i32, i32
  }
  func.func @transform_8(%arg0: i32, %arg1: i32) -> (i32, i32) {
    %c0_i32 = arith.constant 0 : i32
    %c0_i32_0 = arith.constant 0 : i32
    %c0_i32_1 = arith.constant 0 : i32
    return %c0_i32, %c0_i32_0 : i32, i32
  }
  func.func @transform_9(%arg0: i32, %arg1: i32) -> (i32, i32) {
    %c0_i32 = arith.constant 0 : i32
    %c0_i32_0 = arith.constant 0 : i32
    %c0_i32_1 = arith.constant 0 : i32
    return %c0_i32, %c0_i32_0 : i32, i32
  }
  func.func @transform_10(%arg0: i32, %arg1: i32) -> (i32, i32) {
    %c0_i32 = arith.constant 0 : i32
    %c0_i32_0 = arith.constant 0 : i32
    %c0_i32_1 = arith.constant 0 : i32
    return %c0_i32, %c0_i32_0 : i32, i32
  }
  func.func @transform_11(%arg0: i32, %arg1: i32) -> (i32, i32, i32) {
    %c0_i32 = arith.constant 0 : i32
    %c0_i32_0 = arith.constant 0 : i32
    return %arg0, %arg1, %c0_i32 : i32, i32, i32
  }
}

</mosaic_0001>

<bundles_post_ra>
// kernel: tpu_custom_call.1
= control target key start
LH: loop header
LB: loop body
LE: loop exit
PB: predicated region body
PF: predicated region fallthrough
CT: control target
= control target key end

     0   :  { %s2617_s0 = inlined_call_operand.vmem [shape: f32[2,8,32], index: 0, kind: input, shape index: {}]   ;;  %s2618_s1 = inlined_call_operand.hbm [shape: f32[1,32], index: 1, kind: input, shape index: {}]   ;;  %s2619_s2 = inlined_call_operand.hbm [shape: bf16[32,32], index: 2, kind: input, shape index: {}]   ;;  %s2620_s3 = inlined_call_operand.hbm [shape: bf16[32,32], index: 3, kind: input, shape index: {}]   ;;  %s2621_s4 = inlined_call_operand.hbm [shape: bf16[32,32], index: 4, kind: input, shape index: {}]   ;;  %s2622_s5 = inlined_call_operand.vmem [shape: bf16[32,32], index: 5, kind: input, shape index: {}]   ;;  %s2623_s6 = inlined_call_operand.hbm [shape: bf16[4,8,8], index: 6, kind: input, shape index: {}]   ;;  %s2624_s7 = inlined_call_operand.vmem [shape: bf16[32,16], index: 7, kind: input, shape index: {}]   ;;  %s2625_s8 = inlined_call_operand.hbm [shape: f32[1,16], index: 8, kind: input, shape index: {}]   ;;  %s2626_s9 = inlined_call_operand.vmem [shape: bf16[16,32], index: 9, kind: input, shape index: {}]   ;;  %s2627_s10 = inlined_call_operand.vmem [shape: f32[1,32], index: 10, kind: input, shape index: {}]   ;;  %s2628_s11 = inlined_call_operand.hbm [shape: f32[2,8,32], index: 11, kind: output, shape index: {}]  }
   0x1   :  { %2637 = sst [smem:[#allocation28_spill]] %s2619_s2 }
   0x2   :  { %16 = vsyncpa [#allocation7], 0 }
   0x3   :  { %17 = vsyncpa [#allocation10], 0 }
   0x4   :  { %18 = vsyncpa [#allocation13], 0 }
   0x5   :  { %19 = vsyncpa [#allocation16], 0 }
   0x6   :  { %20 = vsyncpa [#allocation8], 0 }
   0x7   :  { %22 = vsyncpa [#allocation8 + $0x1], 0  ;;  %s2292_s17 = smov 0   ;;  %s2294_s18 = smov 0  }
   0x8   :  { %s2296_s19 = smov 0   ;;  %s2298_s20 = smov 0  }
   0x9   :  { %s2300_s21 = smov 0   ;;  %s2302_s22 = smov 0  }
   0xa LB: > { %2638 = sst [smem:[#allocation23_spill]] %s2201_s19  ;;  %s1624_s23 = sadd.s32 4294967295, %s2213_s22   ;;  %s2213_s22 = sphi %s2302_s22, %s28_s22   ;;  %s2209_s21 = sphi %s2300_s21, %s2658_s21   ;;  %s2205_s20 = sphi %s2298_s20, %s2657_s20   ;;  %s2201_s19 = sphi %s2296_s19, %s2656_s19   ;;  %s2197_s18 = sphi %s2294_s18, %s2660_s18   ;;  %s2193_s17 = sphi %s2292_s17, %s2659_s17  }
   0xb   : > { %2639 = sst [smem:[#allocation24_spill]] %s2209_s21  ;;  %s1625_s24 = sadd.s32 4294967294, %s2213_s22  }
   0xc   : > { %s40_s25 = sadd.s32 1, %s2209_s21  ;;  %s290_s26 = sadd.s32 1, %s2201_s19 }
   0xd   : > { %p42_p0 = scmp.ge.s32.totalorder %s40_s25, 2  ;;  %p300_p1 = scmp.ne.s32.totalorder %s2201_s19, %s2197_s18 }
   0xe   : > { %p301_p2 = scmp.eq.s32.totalorder %s1624_s23, 1  ;;  %p306_p3 = scmp.ne.s32.totalorder %s2197_s18, %s2193_s17 }
   0xf   : > { %s2662_s25 = smov (%p42_p0, %s40_s25), 0  ;;  %p307_p5 = scmp.eq.s32.totalorder %s1625_s24, 1 }
  0x10   : > { %2640 = sst [smem:[#allocation25_spill]] %s2662_s25  ;;  %p2332_p4 = por %p301_p2, %p300_p1 }
  0x11   : > { %s285_s28 = ssub.s32 %s2209_s21, %s2662_s25  ;;  %p1626_p6 = scmp.ge.s32.totalorder %s2213_s22, 1 }
  0x12   : > { %s2641_s27 = scalar_select %p2332_p4, 1, 0 }
  0x13   : > { %p288_p7 = scmp.eq.s32.totalorder %s285_s28, 0  ;;  %p2339_p8 = por %p307_p5, %p306_p3 }
  0x14   : > { %p314_p9 = scmp.lt.s32.totalorder %s2213_s22, 3  ;;  %p2351_p11 = scmp.eq.s32.totalorder %s1624_s23, 0 }
  0x15   : > { %s2642_s29 = scalar_select %p2339_p8, 1, 0 }
  0x16   : > { %s2345_s30 = scalar_select %p288_p7, %s2201_s19, %s290_s26  }
  0x17   : > { %2643 = sst [smem:[#allocation26_spill]] %s2642_s29  ;;  %p2347_p10 = pnand %p1626_p6, %p314_p9 }
  0x18   : > { %2644 = sst [smem:[#allocation27_spill]] %s2345_s30  ;;  %s2215_s14 = smov [#allocation9]  }
  0x19   : > { %s2645_s12 = scalar_select %p2347_p10, 1, 0 }
  0x1a   : > { %s2646_s13 = scalar_select %p2351_p11, 1, 0 }
  0x1b   : > { %p1835_p12 = pneg %p2347_p10  ;;  %s344_s15 = sshll.u32 %s2215_s14, 4  ;;  %s345_s15 = int_to_ptr.vmem [resolvable:$true] %s344_s15 }
  0x1c   : > { %s2216_s24 = smov [#allocation12]   ;;  %s1976_s28 = scalar_lea.vmem %s345_s15, 256 }
  0x1d   : > { %p2359_p13 = pnand %p2351_p11, %p1835_p12  ;;  %s370_s26 = sshll.u32 %s2216_s24, 4  ;;  %s371_s26 = int_to_ptr.vmem [resolvable:$true] %s370_s26 }
  0x1e   : > { %p1977_p1 = scmp.ne.s32.totalorder %s345_s15, %s1976_s28  ;;  %p1984_p5 = scmp.lt.s32.totalorder %s345_s15, %s345_s15 }
  0x1f   : > { %p2365_p0 = pneg %p2359_p13  ;;  %p1985_p6 = scmp.lt.s32.totalorder %s1976_s28, %s1976_s28 }
  0x21   : > { %p1979_p2 = pnand %p1977_p1, %p2365_p0  ;;  %p1986_p7 = por %p1985_p6, %p1984_p5 }
  0x23   : > { %p1980_p3 = pneg %p1979_p2 }
  0x25   : > { %p1987_p9 = pnand %p1986_p7, %p1980_p3 }
  0x27   : > { %1990 = shalt.err (!%p1987_p9)
}
  0x28   : > { %s2217_s14 = smov 64   ;;  %s2218_s24 = smov 4  }
  0x29   : > { %s2649_s2 = sld [smem:[#allocation28_spill]]  ;;  %s2002_s30 = scalar_lea.vmem %s371_s26, 256 }
  0x2a   : > { %p2003_p12 = scmp.ne.s32.totalorder %s371_s26, %s2002_s30  ;;  %p2010_p5 = scmp.lt.s32.totalorder %s371_s26, %s371_s26 }
  0x2b   : > { %p2011_p3 = scmp.lt.s32.totalorder %s2002_s30, %s2002_s30 }
  0x2c   : > { %p2005_p1 = pnand %p2003_p12, %p2365_p0 }
  0x2d   : > { %p2012_p6 = por %p2011_p3, %p2010_p5 }
  0x2e   : > { %p2006_p2 = pneg %p2005_p1 }
  0x2f   : > { %1841 = dma.hbm_to_vmem [thread:$0]  (!%p2359_p13), %s2649_s2, 256, %s345_s15, [#allocation10], %s2217_s14, %s2217_s14, %s2218_s24  }
  0x30   : > { %p2013_p7 = pnand %p2012_p6, %p2006_p2 }
  0x32   : > { %2016 = shalt.err (!%p2013_p7)
}
  0x33   : > { %1847 = dma.hbm_to_vmem [thread:$0]  (!%p2359_p13), %s2621_s4, 256, %s371_s26, [#allocation13], %s2217_s14, %s2217_s14, %s2218_s24  }
  0x34   : > { %s2219_s21 = smov [#allocation6]   ;;  %s2220_s15 = smov [#allocation11]  }
  0x35   : > { %s334_s25 = sshll.u32 %s2219_s21, 4  ;;  %s357_s2 = sshll.u32 %s2220_s15, 4  ;;  %s335_s25 = int_to_ptr.vmem [resolvable:$true] %s334_s25  ;;  %s358_s2 = int_to_ptr.vmem [resolvable:$true] %s357_s2 }
  0x36   : > { %s2028_s29 = scalar_lea.vmem %s335_s25, 16  ;;  %s2035_s30 = scalar_lea.vmem %s335_s25, 32 }
  0x37   : > { %p2029_p9 = scmp.ne.s32.totalorder %s335_s25, %s2028_s29  ;;  %p2036_p2 = scmp.lt.s32.totalorder %s335_s25, %s335_s25 }
  0x38   : > { %p2037_p5 = scmp.lt.s32.totalorder %s2035_s30, %s2028_s29 }
  0x39   : > { %p2031_p12 = pnand %p2029_p9, %p2365_p0 }
  0x3a   : > { %p2038_p3 = por %p2037_p5, %p2036_p2 }
  0x3b   : > { %p2032_p1 = pneg %p2031_p12 }
  0x3d   : > { %p2039_p6 = pnand %p2038_p3, %p2032_p1 }
  0x3f   : > { %2042 = shalt.err (!%p2039_p6)
}
  0x40   : > { %1838 = dma.hbm_to_vmem [thread:$0]  (!%p2359_p13), %s2618_s1, 16, %s335_s25, [#allocation7]  }
  0x41   : > { %s2054_s28 = scalar_lea.vmem %s358_s2, 256  ;;  %p2062_p12 = scmp.lt.s32.totalorder %s358_s2, %s358_s2 }
  0x42   : > { %p2055_p7 = scmp.ne.s32.totalorder %s358_s2, %s2054_s28  ;;  %p2063_p4 = scmp.lt.s32.totalorder %s2054_s28, %s2054_s28 }
  0x44   : > { %p2057_p8 = pnand %p2055_p7, %p2365_p0  ;;  %p2064_p11 = por %p2063_p4, %p2062_p12 }
  0x46   : > { %p2058_p9 = pneg %p2057_p8 }
  0x48   : > { %p2065_p10 = pnand %p2064_p11, %p2058_p9 }
  0x4a   : > { %2068 = shalt.err (!%p2065_p10)
}
  0x4b   : > { %1844 = dma.hbm_to_vmem [thread:$0]  (!%p2359_p13), %s2620_s3, 256, %s358_s2, [#allocation10], %s2217_s14, %s2217_s14, %s2218_s24  }
  0x4c   : > { %s2221_s25 = smov [#allocation14]   ;;  %s2222_s30 = smov [#allocation15]  }
  0x4d   : > { %s388_s15 = sshll.u32 %s2221_s25, 4  ;;  %s405_s19 = sshll.u32 %s2222_s30, 4  ;;  %s389_s15 = int_to_ptr.vmem [resolvable:$true] %s388_s15  ;;  %s406_s19 = int_to_ptr.vmem [resolvable:$true] %s405_s19 }
  0x4e   : > { %s2080_s26 = scalar_lea.vmem %s389_s15, 256  ;;  %p2088_p11 = scmp.lt.s32.totalorder %s389_s15, %s389_s15 }
  0x4f   : > { %p2081_p8 = scmp.ne.s32.totalorder %s389_s15, %s2080_s26  ;;  %p2089_p1 = scmp.lt.s32.totalorder %s2080_s26, %s2080_s26 }
  0x51   : > { %p2083_p4 = pnand %p2081_p8, %p2365_p0  ;;  %p2090_p2 = por %p2089_p1, %p2088_p11 }
  0x53   : > { %p2084_p10 = pneg %p2083_p4 }
  0x55   : > { %p2091_p5 = pnand %p2090_p2, %p2084_p10 }
  0x57   : > { %2094 = shalt.err (!%p2091_p5)
}
  0x58   : > { %1850 = dma.hbm_to_vmem [thread:$0]  (!%p2359_p13), %s2623_s6, 256, %s389_s15, [#allocation13], %s2217_s14, %s2217_s14, %s2218_s24  }
  0x59   : > { %s2106_s29 = scalar_lea.vmem %s406_s19, 16  ;;  %s2113_s21 = scalar_lea.vmem %s406_s19, 32 }
  0x5a   : > { %p2107_p3 = scmp.ne.s32.totalorder %s406_s19, %s2106_s29  ;;  %p2114_p9 = scmp.lt.s32.totalorder %s406_s19, %s406_s19 }
  0x5b   : > { %p2115_p12 = scmp.lt.s32.totalorder %s2113_s21, %s2106_s29 }
  0x5c   : > { %p2109_p6 = pnand %p2107_p3, %p2365_p0 }
  0x5d   : > { %p2116_p8 = por %p2115_p12, %p2114_p9 }
  0x5e   : > { %p2110_p7 = pneg %p2109_p6 }
  0x60   : > { %p2117_p4 = pnand %p2116_p8, %p2110_p7 }
  0x62   : > { %2120 = shalt.err (!%p2117_p4)
}
  0x63   : > { %1853 = dma.hbm_to_vmem [thread:$0]  (!%p2359_p13), %s2625_s8, 16, %s406_s19, [#allocation16]  }
  0x64   : > { %p2650_p10 = scmp.ne.s32.totalorder %s2645_s12, 0 }
  0x65   : > { %p2651_p11 = scmp.ne.s32.totalorder (!%p2650_p10), %s2646_s13, 0 }
  0x66   : > { %424 = sbr.rel (%p2650_p10) target bundleno = 2162 (0x872), region = 64 }
  0x6b   : > { %2172 = dma.done.wait (%p2651_p11), [#allocation7], 16  }
  0x6c   : > { %2174 = vsyncadd (%p2651_p11), [#allocation7], 4294967280 }
  0x6d   : > { %2176 = dma.done.wait (%p2651_p11), [#allocation10], 512  }
  0x6e   : > { %2178 = vsyncadd (%p2651_p11), [#allocation10], 4294966784 }
  0x6f   : > { %2180 = dma.done.wait (%p2651_p11), [#allocation13], 512  }
  0x70   : > { %2182 = vsyncadd (%p2651_p11), [#allocation13], 4294966784 }
  0x71   : > { %2184 = dma.done.wait (%p2651_p11), [#allocation16], 16  }
  0x72   : > { %2186 = vsyncadd (%p2651_p11), [#allocation16], 4294967280  ;;  %p483_p13 = scmp.lt.s32.totalorder %s2205_s20, 1  ;;  %vm494_vm0 = vcmask 261120   ;;  %v1936_v3 = vld [vmem:[#allocation11 + $0x8] sm:$0xff]   ;;  %v1937_v4 = vld [vmem:[#allocation12 + $0x8] sm:$0xff]  }
  0x73   : > { %v2223_v5 = vmov 0.0   ;;  %v1938_v6 = vld [vmem:[#allocation11] sm:$0xff]   ;;  %v1939_v7 = vld [vmem:[#allocation12] sm:$0xff]   ;;  %vm2224_vm1 = vmmov 0   ;;  %v1642_v12 = vld [vmem:[#allocation6] ss:$0 sm:$0xff] }
  0x74   : > { %s484_s12 = scalar_select %p483_p13, %s2205_s20, 1  ;;  %1715 = vmatprep.subr.bf16.mxu0 %v2223_v5  ;;  %1723 = vmatprep.subr.bf16.mxu1 %v2223_v5  ;;  %vm512_vm2 = vcmask 257024   ;;  %v1940_v15 = vld [vmem:[#allocation9 + $0x8] sm:$0xff]   ;;  %v1941_v17 = vld [vmem:[#allocation9] sm:$0xff]   ;;  %vm647_vm3 = vcmask 60416   ;;  %vm808_vm4 = vcmask 1043456  }
  0x75   : > { %1716 = vmatpush3.bf16.msra.mxu0 %v1936_v3  ;;  %1724 = vmatpush3.bf16.msra.mxu1 %v1937_v4  ;;  %s2225_s13 = smov 112   ;;  %s2226_s15 = smov 120   ;;  %vm804_vm5 = vcmask 64512   ;;  %v802_v54 = vld [vmem:[#allocation14] sm:$0xff]   ;;  %v1040_v3 = vld [vmem:[#allocation14 + $0x8] sm:$0xff]   ;;  %vm1035_vm6 = vcmask 126016  }
  0x76   : > { %s1641_s16 = sshll.u32 %s484_s12, 3  ;;  %1717 = vmatprep.subr.bf16.mxu0 %v2223_v5  ;;  %1725 = vmatprep.subr.bf16.mxu1 %v2223_v5  ;;  %s2227_s19 = smov 104   ;;  %v803_v55 = vunpack.c.l.bf16 %v802_v54  ;;  %v918_v62 = vunpack.c.h.bf16 %v802_v54  ;;  %vm1157_vm7 = vcmask 191616   ;;  %vm1279_vm8 = vcmask 257216  }
  0x77   : > { %s486_s24 = scalar_lea.vmem %s2617_s0, %s1641_s16  ;;  %1719 = vmatprep.mubr.msk.bf16.mxu0 %vm2224_vm1, %v2223_v5  ;;  %1727 = vmatprep.mubr.msk.bf16.mxu1 %vm2224_vm1, %v2223_v5  ;;  %s2228_s26 = smov 8   ;;  %vm1425_vm9 = vcmask 130048  }
  0x78   : > { %v2446_v0 = vld [vmem:[%s486_s24] sm:$0xff]  ;;  %s2229_s25 = smov 16   ;;  %s2230_s16 = smov 24  }
  0x79   : > { %v493_v1 = vmul.f32 %v2446_v0, %v2446_v0  ;;  %1718 = vmatpush3.bf16.msra.mxu0 %v1938_v6  ;;  %1726 = vmatpush3.bf16.msra.mxu1 %v1939_v7  ;;  %v1041_v7 = vunpack.c.l.bf16 %v1040_v3  ;;  %s1675_s28 = sshll.u32 %s2205_s20, 7  ;;  %p2652_p1 = scmp.ne.s32.totalorder %s2641_s27, 0 }
  0x7a   : > { %1731 = vmatprep.subr.bf16.mxu0 %v2223_v5  ;;  %1739 = vmatprep.subr.bf16.mxu1 %v2223_v5  ;;  %s2576_s12 = scalar_lea.hbm %s2628_s11, %s1675_s28  ;;  %s2231_s20 = smov [#allocation17]  }
  0x7b   : > { %v495_v2 = vsel %vm494_vm0, %v493_v1, 0.0  ;;  %s2125_s14 = sshll.u32 %s2231_s20, 4  ;;  %s2126_s14 = int_to_ptr.vmem [resolvable:$false] %s2125_s14 }
  0x7c   : > { %496 = vadd.xlane.f32.xlu0 %v495_v2  ;;  %s2127_s24 = scalar_lea.vmem %s2126_s14, 256 }
 0x105   : > { %v497_v8 = vpop.xlane.xlu0 %496 }
 0x106   : > { %v499_v9 = vmul.f32 0.03125, %v497_v8 }
 0x108   : > { %v500_v10 = vadd.f32 1e-06, %v499_v9 }
 0x10a   : > { %1947 = vrsqrt.f32 %v500_v10 }
 0x117   : > { %v1948_v11 = vpop.eup %1947 }
 0x118   : > { %v502_v13 = vmul.f32 %v1948_v11, %v2446_v0 }
 0x11a   : > { %v510_v14 = vmul.f32 %v1642_v12, %v502_v13 }
 0x11c   : > { %v511_v16 = vpack.c.bf16 %v510_v14, %v510_v14  ;;  %v1163_v14 = vunpack.c.h.bf16 %v1040_v3 }
 0x11e   : > { %513 = vst.msk [vmem:[#allocation2] sm:$0xf] %vm512_vm2, %v511_v16  ;;  %1720 = vmatmul.mubr.msk.bf16.vlgmr.msra.gmra.mxu0 %vm494_vm0, %v511_v16  ;;  %1728 = vmatmul.mubr.msk.bf16.vlgmr.msra.gmra.mxu1 %vm494_vm0, %v511_v16 }
 0x11f   : > { %1732 = vmatpush3.bf16.msra.mxu0 %v1940_v15  ;;  %1735 = vmatprep.mubr.msk.bf16.mxu0 %vm2224_vm1, %v2223_v5 }
 0x120   : > { %1733 = vmatprep.subr.bf16.mxu0 %v2223_v5  ;;  %1741 = vmatprep.mubr.msk.bf16.mxu1 %vm2224_vm1, %v2223_v5 }
 0x123   : > { %1734 = vmatpush3.bf16.msra.mxu0 %v1941_v17 }
 0x124   : > { %1745 = vmatprep.subr.bf16.mxu0 %v2223_v5 }
 0x125   : > { %v739_v18 = vld [vmem:[#allocation2] sm:$0xf] }
 0x126   : > { %1736 = vmatmul.mubr.msk.bf16.vlgmr.msra.gmra.mxu0 %vm494_vm0, %v739_v18 }
 0x127   : > { %1747 = vmatprep.mubr.msk.bf16.mxu0 %vm2224_vm1, %v2223_v5 }
 0x1de   : > { %v567_v19 = vpop.f32.mrf.mxu0  ;;  %v624_v20 = vpop.f32.mrf.mxu1 }
 0x1df   : > { %v573_v21 = vpack.c.bf16 %v567_v19, %v567_v19  ;;  %v2473_v22 = vpack.c.bf16 %v624_v20, %v624_v20 }
 0x1e0   : > { %v1721_v23 = vpop.f32.mrf.mxu0  ;;  %v1729_v24 = vpop.f32.mrf.mxu1 }
 0x1e1   : > { %649 = vst.msk [vmem:[#allocation4] sm:$0xf] %vm647_vm3, %v2473_v22  ;;  %680 = vrot.lane.b32.xlu1 %v573_v21, %s2225_s13  ;;  %651 = vrot.lane.b32.xlu0 %v573_v21, %s2226_s15 }
 0x1e2   : > { %v570_v25 = vpop.f32.mrf.mxu0  ;;  %v627_v26 = vpop.f32.mrf.mxu1 }
 0x1e4   : > { %v1722_v27 = vpop.f32.mrf.mxu0  ;;  %v1730_v28 = vpop.f32.mrf.mxu1 }
 0x1e5   : > { %706 = vrot.lane.b32.xlu1 %v573_v21, %s2227_s19 }
 0x1e6   : > { %v794_v29 = vpop.f32.mrf.mxu0 }
 0x1e7   : > { %v800_v30 = vpack.c.bf16 %v794_v29, %v794_v29 }
 0x1e8   : > { %v1737_v31 = vpop.f32.mrf.mxu0  ;;  %v864_v32 = vld [vmem:[#allocation4] sm:$0xf] }
 0x1e9   : > { %1042 = vrot.lane.b32.xlu0 %v800_v30, %s2225_s13  ;;  %v869_v33 = vsel %vm808_vm4, %v864_v32, 0 }
 0x1ea   : > { %v797_v34 = vpop.f32.mrf.mxu0  ;;  %1746 = vmatpush3.bf16.msra.mxu0 %v869_v33 }
 0x1eb   : > { %1757 = vmatprep.subr.bf16.mxu0 %v2223_v5 }
 0x1ec   : > { %v1738_v35 = vpop.f32.mrf.mxu0 }
 0x208   : > { %631 = vxpose.xlu1.c.b16.start.end [1/1] (short) (narrow) %v573_v21, 16 }
 0x20c   : > { %920 = vrot.lane.b32.xlu1 %v800_v30, %s2226_s15 }
 0x210   : > { %1164 = vrot.lane.b32.xlu1 %v800_v30, %s2227_s19 }
 0x253   : > { %v681_v36 = vpop.permute.xlu1 %680  ;;  %v652_v37 = vpop.permute.xlu0 %651 }
 0x254   : > { %654 = vxpose.xlu0.c.b16.start.end [1/1] (short) (narrow) %v652_v37, 16  ;;  %683 = vxpose.xlu1.c.b16.start.end [1/1] (short) (narrow) %v681_v36, 16 }
 0x257   : > { %v707_v38 = vpop.permute.xlu1 %706 }
 0x258   : > { %709 = vxpose.xlu0.c.b16.start.end [1/1] (short) (narrow) %v707_v38, 16 }
 0x25b   : > { %v1043_v43 = vpop.permute.xlu0 %1042 }
 0x26a   : > { %v639_v39 = vpop.trf.xlu1 }
 0x26b   : > { %648 = vst.msk [vmem:[#allocation3] sm:$0xf] %vm647_vm3, %v639_v39 }
 0x272   : > { %v801_v40 = vld [vmem:[#allocation3] sm:$0xf] }
 0x273   : > { %v810_v41 = vsel %vm808_vm4, %v801_v40, 0 }
 0x274   : > { %1740 = vmatpush3.bf16.msra.mxu1 %v810_v41 }
 0x275   : > { %1751 = vmatprep.subr.bf16.mxu1 %v2223_v5 }
 0x277   : > { %1742 = vmatmul.mubr.msk.bf16.vlgmr.msra.gmra.mxu1 %vm804_vm5, %v800_v30 }
 0x278   : > { %1753 = vmatprep.mubr.msk.bf16.mxu1 %vm2224_vm1, %v2223_v5 }
 0x27e   : > { %v921_v42 = vpop.permute.xlu1 %920 }
 0x282   : > { %v1165_v44 = vpop.permute.xlu1 %1164 }
 0x2b6   : > { %v662_v45 = vpop.trf.xlu0  ;;  %v691_v46 = vpop.trf.xlu1 }
 0x2b7   : > { %671 = vst.msk [vmem:[#allocation3 + $0x4] sm:$0xf] %vm647_vm3, %v662_v45  ;;  %700 = vst.msk [vmem:[#allocation3 + $0x8] sm:$0xf] %vm647_vm3, %v691_v46 }
 0x2ba   : > { %v717_v47 = vpop.trf.xlu0 }
 0x2bb   : > { %726 = vst.msk [vmem:[#allocation3 + $0xc] sm:$0xf] %vm647_vm3, %v717_v47 }
 0x2be   : > { %v915_v48 = vld [vmem:[#allocation3 + $0x4] sm:$0xf]  ;;  %v1038_v49 = vld [vmem:[#allocation3 + $0x8] sm:$0xf] }
 0x2bf   : > { %v926_v50 = vsel %vm808_vm4, %v915_v48, 0  ;;  %v1048_v51 = vsel %vm808_vm4, %v1038_v49, 0 }
 0x2c0   : > { %1752 = vmatpush3.bf16.msra.mxu1 %v926_v50 }
 0x2c1   : > { %1763 = vmatprep.subr.bf16.mxu1 %v2223_v5 }
 0x2c2   : > { %v1160_v52 = vld [vmem:[#allocation3 + $0xc] sm:$0xf] }
 0x2c3   : > { %1754 = vmatmul.mubr.msk.bf16.vlgmr.msra.gmra.mxu1 %vm804_vm5, %v921_v42  ;;  %v1170_v53 = vsel %vm808_vm4, %v1160_v52, 0 }
 0x2c4   : > { %1764 = vmatpush3.bf16.msra.mxu1 %v1048_v51  ;;  %1765 = vmatprep.mubr.msk.bf16.mxu1 %vm2224_vm1, %v2223_v5 }
 0x2c5   : > { %1775 = vmatprep.subr.bf16.mxu1 %v2223_v5 }
 0x2cb   : > { %1766 = vmatmul.mubr.msk.bf16.vlgmr.msra.gmra.mxu1 %vm804_vm5, %v1043_v43 }
 0x2cc   : > { %1776 = vmatpush3.bf16.msra.mxu1 %v1170_v53  ;;  %1777 = vmatprep.mubr.msk.bf16.mxu1 %vm2224_vm1, %v2223_v5 }
 0x2cd   : > { %1787 = vmatprep.subr.bf16.mxu1 %v2223_v5 }
 0x2d3   : > { %1778 = vmatmul.mubr.msk.bf16.vlgmr.msra.gmra.mxu1 %vm804_vm5, %v1165_v44 }
 0x2d4   : > { %1791 = vmatprep.mubr.msk.bf16.mxu1 %vm2224_vm1, %v2223_v5 }
 0x337   : > { %v846_v56 = vpop.f32.mrf.mxu1 }
 0x338   : > { %v847_v57 = vadd.f32 %v846_v56, %v803_v55 }
 0x339   : > { %v1743_v58 = vpop.f32.mrf.mxu1 }
 0x33a   : > { %v852_v59 = vsel %vm804_vm5, %v847_v57, -inf }
 0x33b   : > { %853 = vmax.xlane.f32.xlu0 %v852_v59  ;;  %v849_v60 = vpop.f32.mrf.mxu1 }
 0x33d   : > { %v1744_v61 = vpop.f32.mrf.mxu1 }
 0x383   : > { %v962_v63 = vpop.f32.mrf.mxu1 }
 0x384   : > { %v963_v1 = vadd.f32 %v962_v63, %v918_v62 }
 0x385   : > { %v1755_v2 = vpop.f32.mrf.mxu1 }
 0x386   : > { %v968_v4 = vsel %vm804_vm5, %v963_v1, -inf }
 0x387   : > { %969 = vmax.xlane.f32.xlu0 %v968_v4  ;;  %v965_v6 = vpop.f32.mrf.mxu1 }
 0x389   : > { %v1756_v8 = vpop.f32.mrf.mxu1 }
 0x38b   : > { %v1084_v9 = vpop.f32.mrf.mxu1 }
 0x38c   : > { %v1085_v10 = vadd.f32 %v1084_v9, %v1041_v7 }
 0x38d   : > { %v1767_v11 = vpop.f32.mrf.mxu1 }
 0x38e   : > { %v1090_v12 = vsel %vm804_vm5, %v1085_v10, -inf }
 0x38f   : > { %1091 = vmax.xlane.f32.xlu0 %v1090_v12  ;;  %v1087_v13 = vpop.f32.mrf.mxu1 }
 0x391   : > { %v1768_v15 = vpop.f32.mrf.mxu1 }
 0x392   : > { %v1942_v15 = vld [vmem:[%s2622_s5 + $0x8] sm:$0xff]  }
 0x393   : > { %v1206_v16 = vpop.f32.mrf.mxu1  ;;  %1788 = vmatpush3.bf16.msra.mxu1 %v1942_v15 }
 0x394   : > { %v1207_v17 = vadd.f32 %v1206_v16, %v1163_v14  ;;  %1789 = vmatprep.subr.bf16.mxu1 %v2223_v5 }
 0x395   : > { %v1779_v18 = vpop.f32.mrf.mxu1 }
 0x396   : > { %v1212_v19 = vsel %vm804_vm5, %v1207_v17, -inf }
 0x397   : > { %1213 = vmax.xlane.f32.xlu0 %v1212_v19  ;;  %v1209_v20 = vpop.f32.mrf.mxu1 }
 0x399   : > { %v1780_v21 = vpop.f32.mrf.mxu1 }
 0x3c4   : > { %v854_v23 = vpop.xlane.xlu0 %853 }
 0x3c5   : > { %v855_v24 = vsub.f32 %v847_v57, %v854_v23  ;;  %v1944_v23 = vld [vmem:[%s2624_s7 + $0x8] sm:$0xff]  }
 0x3c7   : > { %v856_v25 = vmul.f32 1.442695, %v855_v24 }
 0x3c9   : > { %1949 = vpow2.f32 %v856_v25 }
 0x3d6   : > { %v1950_v26 = vpop.eup %1949 }
 0x3d7   : > { %v858_v27 = vsel %vm804_vm5, %v1950_v26, 0.0 }
 0x3d8   : > { %859 = vadd.xlane.f32.xlu1 %v858_v27 }
 0x3e9   : > { %675 = vrot.lane.b32.xlu1 %v2473_v22, %s2226_s15  ;;  %s480_s15 = sand.u32 1, %s2197_s18  }
 0x3ed   : > { %727 = vrot.lane.b32.xlu1 %v2473_v22, %s2227_s19  ;;  %s1640_s19 = sshll.u32 %s480_s15, 3 }
 0x3ee   : > { %s482_s29 = scalar_lea.vmem [#allocation17], %s1640_s19 }
 0x3ef   : > { %s1487_s21 = sshll.u32 %s482_s29, 4  ;;  %s1488_s21 = int_to_ptr.vmem [resolvable:$true] %s1487_s21 }
 0x3f0   : > { %s2121_s23 = scalar_lea.vmem %s1488_s21, 128  ;;  %p2128_p3 = scmp.lt.s32.totalorder %s1488_s21, %s2126_s14 }
 0x3f1   : > { %p2122_p0 = scmp.ne.s32.totalorder %s1488_s21, %s2121_s23  ;;  %p2129_p6 = scmp.lt.s32.totalorder %s2127_s24, %s2121_s23 }
 0x3f3   : > { %p2123_p2 = pnand %p2122_p0, %p2652_p1  ;;  %p2130_p7 = por %p2129_p6, %p2128_p3 }
 0x3f5   : > { %p2124_p5 = pneg %p2123_p2 }
 0x3f7   : > { %p2131_p9 = pnand %p2130_p7, %p2124_p5 }
 0x410   : > { %v970_v28 = vpop.xlane.xlu0 %969 }
 0x411   : > { %v971_v29 = vsub.f32 %v963_v1, %v970_v28 }
 0x413   : > { %v972_v30 = vmul.f32 1.442695, %v971_v29 }
 0x415   : > { %1951 = vpow2.f32 %v972_v30 }
 0x418   : > { %v1092_v31 = vpop.xlane.xlu0 %1091 }
 0x419   : > { %v1093_v32 = vsub.f32 %v1085_v10, %v1092_v31 }
 0x41b   : > { %v1094_v33 = vmul.f32 1.442695, %v1093_v32 }
 0x41d   : > { %1953 = vpow2.f32 %v1094_v33  ;;  %v1945_v33 = vld [vmem:[%s2624_s7] sm:$0xff]  }
 0x420   : > { %v1214_v34 = vpop.xlane.xlu0 %1213 }
 0x421   : > { %v1215_v35 = vsub.f32 %v1207_v17, %v1214_v34  ;;  %v1943_v17 = vld [vmem:[%s2622_s5] sm:$0xff]  }
 0x422   : > { %v1952_v36 = vpop.eup %1951  ;;  %1790 = vmatpush3.bf16.msra.mxu1 %v1943_v17 }
 0x423   : > { %v1216_v37 = vmul.f32 1.442695, %v1215_v35  ;;  %v974_v38 = vsel %vm804_vm5, %v1952_v36, 0.0  ;;  %1803 = vmatprep.subr.bf16.mxu1 %v2223_v5 }
 0x424   : > { %975 = vadd.xlane.f32.xlu0 %v974_v38 }
 0x425   : > { %1955 = vpow2.f32 %v1216_v37 }
 0x42a   : > { %v1954_v39 = vpop.eup %1953 }
 0x42b   : > { %v1096_v40 = vsel %vm804_vm5, %v1954_v39, 0.0 }
 0x42c   : > { %1097 = vadd.xlane.f32.xlu0 %v1096_v40  ;;  %v1667_v40 = vld [vmem:[#allocation15] ss:$0 sm:$0xff] }
 0x432   : > { %v1956_v41 = vpop.eup %1955 }
 0x433   : > { %v1218_v42 = vsel %vm804_vm5, %v1956_v41, 0.0 }
 0x434   : > { %1219 = vadd.xlane.f32.xlu0 %v1218_v42 }
 0x44a   : > { %701 = vrot.lane.b32.xlu0 %v2473_v22, %s2225_s13 }
 0x461   : > { %v860_v43 = vpop.xlane.xlu1 %859 }
 0x462   : > { %1957 = vrcp.f32 %v860_v43 }
 0x465   : > { %v676_v44 = vpop.permute.xlu1 %675 }
 0x466   : > { %679 = vst.msk [vmem:[#allocation4 + $0x4] sm:$0xf] %vm647_vm3, %v676_v44 }
 0x469   : > { %v728_v45 = vpop.permute.xlu1 %727 }
 0x46a   : > { %731 = vst.msk [vmem:[#allocation4 + $0xc] sm:$0xf] %vm647_vm3, %v728_v45 }
 0x46d   : > { %v981_v48 = vld [vmem:[#allocation4 + $0x4] sm:$0xf] }
 0x46e   : > { %v986_v50 = vsel %vm808_vm4, %v981_v48, 0 }
 0x46f   : > { %v1958_v46 = vpop.eup %1957 }
 0x470   : > { %v862_v47 = vmul.f32 %v1958_v46, %v1950_v26 }
 0x471   : > { %v1225_v61 = vld [vmem:[#allocation4 + $0xc] sm:$0xf] }
 0x472   : > { %v863_v49 = vpack.c.bf16 %v862_v47, %v862_v47  ;;  %v1230_v1 = vsel %vm808_vm4, %v1225_v61, 0  ;;  %v1671_v47 = vld [vmem:[%s2627_s10] ss:$0 sm:$0xff] }
 0x474   : > { %1748 = vmatmul.mubr.msk.bf16.vlgmr.msra.gmra.mxu0 %vm804_vm5, %v863_v49 }
 0x475   : > { %1758 = vmatpush3.bf16.msra.mxu0 %v986_v50  ;;  %1759 = vmatprep.mubr.msk.bf16.mxu0 %vm2224_vm1, %v2223_v5 }
 0x476   : > { %1769 = vmatprep.subr.bf16.mxu0 %v2223_v5 }
 0x4ad   : > { %v976_v22 = vpop.xlane.xlu0 %975 }
 0x4ae   : > { %1959 = vrcp.f32 %v976_v22 }
 0x4b5   : > { %v1098_v51 = vpop.xlane.xlu0 %1097 }
 0x4b6   : > { %1961 = vrcp.f32 %v1098_v51 }
 0x4bb   : > { %v1960_v52 = vpop.eup %1959 }
 0x4bc   : > { %v978_v53 = vmul.f32 %v1960_v52, %v1952_v36 }
 0x4bd   : > { %v1220_v54 = vpop.xlane.xlu0 %1219 }
 0x4be   : > { %v979_v55 = vpack.c.bf16 %v978_v53, %v978_v53  ;;  %1963 = vrcp.f32 %v1220_v54 }
 0x4c0   : > { %1760 = vmatmul.mubr.msk.bf16.vlgmr.msra.gmra.mxu0 %vm804_vm5, %v979_v55 }
 0x4c1   : > { %v702_v56 = vpop.permute.xlu0 %701  ;;  %1771 = vmatprep.mubr.msk.bf16.mxu0 %vm2224_vm1, %v2223_v5 }
 0x4c2   : > { %705 = vst.msk [vmem:[#allocation4 + $0x8] sm:$0xf] %vm647_vm3, %v702_v56 }
 0x4c3   : > { %v1962_v57 = vpop.eup %1961 }
 0x4c4   : > { %v1100_v58 = vmul.f32 %v1962_v57, %v1954_v39  ;;  %v1946_v39 = vld [vmem:[%s2626_s9] sm:$0xff]  }
 0x4c6   : > { %v1101_v62 = vpack.c.bf16 %v1100_v58, %v1100_v58 }
 0x4c9   : > { %v1103_v59 = vld [vmem:[#allocation4 + $0x8] sm:$0xf] }
 0x4ca   : > { %v1108_v60 = vsel %vm808_vm4, %v1103_v59, 0 }
 0x4cb   : > { %1770 = vmatpush3.bf16.msra.mxu0 %v1108_v60  ;;  %v1964_v63 = vpop.eup %1963 }
 0x4cc   : > { %1781 = vmatprep.subr.bf16.mxu0 %v2223_v5  ;;  %v1222_v2 = vmul.f32 %v1964_v63, %v1956_v41 }
 0x4ce   : > { %1772 = vmatmul.mubr.msk.bf16.vlgmr.msra.gmra.mxu0 %vm804_vm5, %v1101_v62  ;;  %v1223_v3 = vpack.c.bf16 %v1222_v2, %v1222_v2 }
 0x4cf   : > { %1782 = vmatpush3.bf16.msra.mxu0 %v1230_v1  ;;  %1783 = vmatprep.mubr.msk.bf16.mxu0 %vm2224_vm1, %v2223_v5 }
 0x4d0   : > { %1795 = vmatprep.subr.bf16.mxu0 %v2223_v5 }
 0x4d6   : > { %1784 = vmatmul.mubr.msk.bf16.vlgmr.msra.gmra.mxu0 %vm804_vm5, %v1223_v3 }
 0x4d7   : > { %1799 = vmatprep.mubr.msk.bf16.mxu0 %vm2224_vm1, %v2223_v5  ;;  %1796 = vmatpush3.bf16.msra.mxu0 %v1944_v23 }
 0x4d8   : > { %1797 = vmatprep.subr.bf16.mxu0 %v2223_v5 }
 0x4db   : > { %1798 = vmatpush3.bf16.msra.mxu0 %v1945_v33 }
 0x534   : > { %v905_v4 = vpop.f32.mrf.mxu0 }
 0x535   : > { %v911_v6 = vpack.c.bf16 %v905_v4, %v905_v4 }
 0x536   : > { %v1749_v7 = vpop.f32.mrf.mxu0 }
 0x537   : > { %913 = vst.msk [vmem:[#allocation5] sm:$0xf] %vm647_vm3, %v911_v6 }
 0x538   : > { %v908_v8 = vpop.f32.mrf.mxu0 }
 0x53a   : > { %v1750_v9 = vpop.f32.mrf.mxu0 }
 0x580   : > { %v1022_v10 = vpop.f32.mrf.mxu0 }
 0x581   : > { %v1679_v11 = vpack.c.bf16 %v1022_v10, %v1022_v10 }
 0x582   : > { %v1761_v12 = vpop.f32.mrf.mxu0 }
 0x583   : > { %1032 = vrot.lane.b32.xlu1 %v1679_v11, %s2228_s26 }
 0x584   : > { %v1025_v13 = vpop.f32.mrf.mxu0 }
 0x586   : > { %v1762_v14 = vpop.f32.mrf.mxu0 }
 0x58e   : > { %v1144_v16 = vpop.f32.mrf.mxu0 }
 0x58f   : > { %v1680_v18 = vpack.c.bf16 %v1144_v16, %v1144_v16 }
 0x590   : > { %v1773_v19 = vpop.f32.mrf.mxu0 }
 0x591   : > { %1154 = vrot.lane.b32.xlu0 %v1680_v18, %s2229_s25 }
 0x592   : > { %v1147_v20 = vpop.f32.mrf.mxu0 }
 0x594   : > { %v1774_v21 = vpop.f32.mrf.mxu0 }
 0x596   : > { %v1266_v24 = vpop.f32.mrf.mxu0 }
 0x597   : > { %v1681_v25 = vpack.c.bf16 %v1266_v24, %v1266_v24 }
 0x598   : > { %v1785_v26 = vpop.f32.mrf.mxu0 }
 0x599   : > { %1276 = vrot.lane.b32.xlu1 %v1681_v25, %s2230_s16  ;;  %s1473_s16 = scalar_lea.sflag [#allocation8], %s480_s15 }
 0x59a   : > { %v1269_v27 = vpop.f32.mrf.mxu0 }
 0x59c   : > { %v1786_v28 = vpop.f32.mrf.mxu0 }
 0x5f5   : > { %v1033_v29 = vpop.permute.xlu1 %1032 }
 0x5f6   : > { %1036 = vst.msk [vmem:[#allocation5] sm:$0xf] %vm1035_vm6, %v1033_v29 }
 0x603   : > { %v1155_v30 = vpop.permute.xlu0 %1154 }
 0x604   : > { %1158 = vst.msk [vmem:[#allocation5] sm:$0xf] %vm1157_vm7, %v1155_v30 }
 0x60b   : > { %v1277_v31 = vpop.permute.xlu1 %1276 }
 0x60c   : > { %1280 = vst.msk [vmem:[#allocation5] sm:$0xf] %vm1279_vm8, %v1277_v31 }
 0x613   : > { %v1281_v32 = vld [vmem:[#allocation5] sm:$0xf] }
 0x614   : > { %1792 = vmatmul.mubr.msk.bf16.vlgmr.msra.gmra.mxu1 %vm494_vm0, %v1281_v32 }
 0x615   : > { %1805 = vmatprep.mubr.msk.bf16.mxu1 %vm2224_vm1, %v2223_v5  ;;  %1804 = vmatpush3.bf16.msra.mxu1 %v1946_v39 }
 0x6d4   : > { %v1335_v34 = vpop.f32.mrf.mxu1 }
 0x6d5   : > { %v1341_v35 = vpack.c.bf16 %v1335_v34, %v1335_v34 }
 0x6d6   : > { %v1793_v36 = vpop.f32.mrf.mxu1 }
 0x6d7   : > { %1800 = vmatmul.mubr.msk.bf16.vlgmr.msra.gmra.mxu0 %vm494_vm0, %v1341_v35 }
 0x6d8   : > { %v1338_v37 = vpop.f32.mrf.mxu1 }
 0x6da   : > { %v1794_v38 = vpop.f32.mrf.mxu1 }
 0x797   : > { %v1402_v5 = vpop.f32.mrf.mxu0 }
 0x798   : > { %v1403_v41 = vadd.f32 %v1667_v40, %v1402_v5 }
 0x799   : > { %v1801_v42 = vpop.f32.mrf.mxu0 }
 0x79a   : > { %v1408_v43 = vmax.f32 %v1403_v41, 0.0 }
 0x79b   : > { %v1405_v44 = vpop.f32.mrf.mxu0 }
 0x79c   : > { %v1409_v45 = vpack.c.bf16 %v1408_v43, %v1408_v43 }
 0x79d   : > { %v1802_v46 = vpop.f32.mrf.mxu0 }
 0x79e   : > { %1806 = vmatmul.mubr.msk.bf16.vlgmr.msra.gmra.mxu1 %vm1425_vm9, %v1409_v45 }
 0x85e   : > { %v1463_v48 = vpop.f32.mrf.mxu1 }
 0x85f   : > { %v1464_v49 = vadd.f32 %v1671_v47, %v1463_v48 }
 0x860   : > { %v1807_v50 = vpop.f32.mrf.mxu1 }
 0x861   : > { %v1469_v22 = vadd.f32 %v1464_v49, %v1335_v34 }
 0x862   : > { %v1466_v51 = vpop.f32.mrf.mxu1 }
 0x863   : > { %v1470_v52 = vadd.f32 %v1469_v22, %v2446_v0 }
 0x864   : > { %v1808_v53 = vpop.f32.mrf.mxu1 }
 0x865   : > { %1471 = vst.msk [vmem:[%s482_s29] sm:$0xff] %vm494_vm0, %v1470_v52 }
 0x866   : > { %2134 = shalt.err (!%p2131_p9)
}
 0x867   : > { %s2135_s13 = scalar_lea.hbm %s2576_s12, 128  ;;  %s2139_s26 = scalar_lea.hbm %s2628_s11, 256 }
 0x868   : > { %p2136_p12 = scmp.ne.s32.totalorder %s2576_s12, %s2135_s13  ;;  %p2140_p10 = scmp.lt.s32.totalorder %s2576_s12, %s2628_s11 }
 0x869   : > { %p2141_p11 = scmp.lt.s32.totalorder %s2139_s26, %s2135_s13 }
 0x86a   : > { %p2137_p8 = pnand %p2136_p12, %p2652_p1 }
 0x86b   : > { %p2142_p13 = por %p2141_p11, %p2140_p10 }
 0x86c   : > { %p2138_p4 = pneg %p2137_p8 }
 0x86e   : > { %p2143_p0 = pnand %p2142_p13, %p2138_p4 }
 0x870   : > { %2146 = shalt.err (!%p2143_p0)
}
 0x871   : > { %1833 = dma.vmem_to_hbm [thread:$0]  (%p2652_p1), %s1488_s21, 128, %s2576_s12, %s1473_s16  }
 0x872 PF: > { %s2653_s29 = sld [smem:[#allocation26_spill]]  ;;  %p1870_p2 = scmp.ge.s32.totalorder %s2213_s22, 2 }
 0x873   : > { %s1499_s25 = sand.u32 1, %s2193_s17  }
 0x874   : > { %s1500_s30 = scalar_lea.sflag [#allocation8], %s1499_s25 }
 0x878   : > { %p2654_p5 = scmp.ne.s32.totalorder %s2653_s29, 0 }
 0x87a   : > { %p1855_p3 = pnand %p1870_p2, %p2654_p5 }
 0x87c   : > { %p1856_p6 = pneg %p1855_p3 }
 0x87e   : > { %2188 = dma.done.wait (%p1856_p6), %s1500_s30, 128  }
 0x87f   : > { %2190 = vsyncadd (%p1856_p6), %s1500_s30, 4294967168  ;;  %s28_s22 = sadd.s32 1, %s2213_s22   ;;  %s2655_s23 = sld [smem:[#allocation23_spill]] }
 0x880   : > { %p25_p7 = scmp.ge.s32.totalorder %s28_s22, 4   ;;  %s2656_s19 = sld [smem:[#allocation27_spill]] }
 0x881   : > { %s2657_s20 = sld [smem:[#allocation24_spill]]  ;;  %s2659_s17 = smov %s2197_s18 }
 0x882   : > { %s2658_s21 = sld [smem:[#allocation25_spill]]  ;;  %27 = sbr.rel (!%p25_p7) target bundleno = 10 (0xa), region = 146 }
 0x885   : > { %s2660_s18 = smov %s2655_s23 }
 0x887   :  { %1505 = vsyncpa [#allocation7], 1 }
 0x888   :  { %1507 = vsyncpa [#allocation7 + $0x1], 1 }
 0x889   :  { %1508 = vsyncpa [#allocation10], 1 }
 0x88a   :  { %1509 = vsyncpa [#allocation13], 1 }
 0x88b   :  { %1510 = vsyncpa [#allocation16], 1 }
 0x88c   :  { %1511 = vsyncpa [#allocation8], 1 }
 0x88d   :  { %1513 = vsyncpa [#allocation8 + $0x1], 1 }

// kernel: tpu_custom_call.1
= control target key start
LH: loop header
LB: loop body
LE: loop exit
PB: predicated region body
PF: predicated region fallthrough
CT: control target
= control target key end

     0   :  { %s2615_s0 = inlined_call_operand.vmem [shape: f32[2,8,32], index: 0, kind: input, shape index: {}]   ;;  %s2616_s1 = inlined_call_operand.hbm [shape: f32[1,32], index: 1, kind: input, shape index: {}]   ;;  %s2617_s2 = inlined_call_operand.hbm [shape: bf16[32,32], index: 2, kind: input, shape index: {}]   ;;  %s2618_s3 = inlined_call_operand.hbm [shape: bf16[32,32], index: 3, kind: input, shape index: {}]   ;;  %s2619_s4 = inlined_call_operand.hbm [shape: bf16[32,32], index: 4, kind: input, shape index: {}]   ;;  %s2620_s5 = inlined_call_operand.vmem [shape: bf16[32,32], index: 5, kind: input, shape index: {}]   ;;  %s2621_s6 = inlined_call_operand.hbm [shape: bf16[4,8,8], index: 6, kind: input, shape index: {}]   ;;  %s2622_s7 = inlined_call_operand.vmem [shape: bf16[32,16], index: 7, kind: input, shape index: {}]   ;;  %s2623_s8 = inlined_call_operand.hbm [shape: f32[1,16], index: 8, kind: input, shape index: {}]   ;;  %s2624_s9 = inlined_call_operand.vmem [shape: bf16[16,32], index: 9, kind: input, shape index: {}]   ;;  %s2625_s10 = inlined_call_operand.vmem [shape: f32[1,32], index: 10, kind: input, shape index: {}]   ;;  %s2626_s11 = inlined_call_operand.hbm [shape: f32[2,8,32], index: 11, kind: output, shape index: {}]  }
   0x1   :  { %2635 = sst [smem:[#allocation28_spill]] %s2617_s2 }
   0x2   :  { %16 = vsyncpa [#allocation7], 0 }
   0x3   :  { %17 = vsyncpa [#allocation10], 0 }
   0x4   :  { %18 = vsyncpa [#allocation13], 0 }
   0x5   :  { %19 = vsyncpa [#allocation16], 0 }
   0x6   :  { %20 = vsyncpa [#allocation8], 0 }
   0x7   :  { %22 = vsyncpa [#allocation8 + $0x1], 0  ;;  %s2290_s17 = smov 0   ;;  %s2292_s18 = smov 0  }
   0x8   :  { %s2294_s19 = smov 0   ;;  %s2296_s20 = smov 0  }
   0x9   :  { %s2298_s21 = smov 0   ;;  %s2300_s22 = smov 0  }
   0xa LB: > { %2636 = sst [smem:[#allocation23_spill]] %s2199_s19  ;;  %s1621_s23 = sadd.s32 4294967295, %s2211_s22   ;;  %s2211_s22 = sphi %s2300_s22, %s28_s22   ;;  %s2207_s21 = sphi %s2298_s21, %s2656_s21   ;;  %s2203_s20 = sphi %s2296_s20, %s2655_s20   ;;  %s2199_s19 = sphi %s2294_s19, %s2654_s19   ;;  %s2195_s18 = sphi %s2292_s18, %s2658_s18   ;;  %s2191_s17 = sphi %s2290_s17, %s2657_s17  }
   0xb   : > { %2637 = sst [smem:[#allocation24_spill]] %s2207_s21  ;;  %s1622_s24 = sadd.s32 4294967294, %s2211_s22  }
   0xc   : > { %s40_s25 = sadd.s32 1, %s2207_s21  ;;  %s290_s26 = sadd.s32 1, %s2199_s19 }
   0xd   : > { %p42_p0 = scmp.ge.s32.totalorder %s40_s25, 2  ;;  %p300_p1 = scmp.ne.s32.totalorder %s2199_s19, %s2195_s18 }
   0xe   : > { %p301_p2 = scmp.eq.s32.totalorder %s1621_s23, 1  ;;  %p306_p3 = scmp.ne.s32.totalorder %s2195_s18, %s2191_s17 }
   0xf   : > { %s2660_s25 = smov (%p42_p0, %s40_s25), 0  ;;  %p307_p5 = scmp.eq.s32.totalorder %s1622_s24, 1 }
  0x10   : > { %2638 = sst [smem:[#allocation25_spill]] %s2660_s25  ;;  %p2330_p4 = por %p301_p2, %p300_p1 }
  0x11   : > { %s285_s28 = ssub.s32 %s2207_s21, %s2660_s25  ;;  %p1623_p6 = scmp.ge.s32.totalorder %s2211_s22, 1 }
  0x12   : > { %s2639_s27 = scalar_select %p2330_p4, 1, 0 }
  0x13   : > { %p288_p7 = scmp.eq.s32.totalorder %s285_s28, 0  ;;  %p2337_p8 = por %p307_p5, %p306_p3 }
  0x14   : > { %p314_p9 = scmp.lt.s32.totalorder %s2211_s22, 3  ;;  %p2349_p11 = scmp.eq.s32.totalorder %s1621_s23, 0 }
  0x15   : > { %s2640_s29 = scalar_select %p2337_p8, 1, 0 }
  0x16   : > { %s2343_s30 = scalar_select %p288_p7, %s2199_s19, %s290_s26  }
  0x17   : > { %2641 = sst [smem:[#allocation26_spill]] %s2640_s29  ;;  %p2345_p10 = pnand %p1623_p6, %p314_p9 }
  0x18   : > { %2642 = sst [smem:[#allocation27_spill]] %s2343_s30  ;;  %s2213_s14 = smov [#allocation9]  }
  0x19   : > { %s2643_s12 = scalar_select %p2345_p10, 1, 0 }
  0x1a   : > { %s2644_s13 = scalar_select %p2349_p11, 1, 0 }
  0x1b   : > { %p1833_p12 = pneg %p2345_p10  ;;  %s337_s15 = sshll.u32 %s2213_s14, 4  ;;  %s338_s15 = int_to_ptr.vmem [resolvable:$true] %s337_s15 }
  0x1c   : > { %s2214_s24 = smov [#allocation12]   ;;  %s1974_s28 = scalar_lea.vmem %s338_s15, 256 }
  0x1d   : > { %p2357_p13 = pnand %p2349_p11, %p1833_p12  ;;  %s363_s26 = sshll.u32 %s2214_s24, 4  ;;  %s364_s26 = int_to_ptr.vmem [resolvable:$true] %s363_s26 }
  0x1e   : > { %p1975_p1 = scmp.ne.s32.totalorder %s338_s15, %s1974_s28  ;;  %p1982_p5 = scmp.lt.s32.totalorder %s338_s15, %s338_s15 }
  0x1f   : > { %p2363_p0 = pneg %p2357_p13  ;;  %p1983_p6 = scmp.lt.s32.totalorder %s1974_s28, %s1974_s28 }
  0x21   : > { %p1977_p2 = pnand %p1975_p1, %p2363_p0  ;;  %p1984_p7 = por %p1983_p6, %p1982_p5 }
  0x23   : > { %p1978_p3 = pneg %p1977_p2 }
  0x25   : > { %p1985_p9 = pnand %p1984_p7, %p1978_p3 }
  0x27   : > { %1988 = shalt.err (!%p1985_p9)
}
  0x28   : > { %s2215_s14 = smov 64   ;;  %s2216_s24 = smov 4  }
  0x29   : > { %s2647_s2 = sld [smem:[#allocation28_spill]]  ;;  %s2000_s30 = scalar_lea.vmem %s364_s26, 256 }
  0x2a   : > { %p2001_p12 = scmp.ne.s32.totalorder %s364_s26, %s2000_s30  ;;  %p2008_p5 = scmp.lt.s32.totalorder %s364_s26, %s364_s26 }
  0x2b   : > { %p2009_p3 = scmp.lt.s32.totalorder %s2000_s30, %s2000_s30 }
  0x2c   : > { %p2003_p1 = pnand %p2001_p12, %p2363_p0 }
  0x2d   : > { %p2010_p6 = por %p2009_p3, %p2008_p5 }
  0x2e   : > { %p2004_p2 = pneg %p2003_p1 }
  0x2f   : > { %1839 = dma.hbm_to_vmem [thread:$0]  (!%p2357_p13), %s2647_s2, 256, %s338_s15, [#allocation10], %s2215_s14, %s2215_s14, %s2216_s24  }
  0x30   : > { %p2011_p7 = pnand %p2010_p6, %p2004_p2 }
  0x32   : > { %2014 = shalt.err (!%p2011_p7)
}
  0x33   : > { %1845 = dma.hbm_to_vmem [thread:$0]  (!%p2357_p13), %s2619_s4, 256, %s364_s26, [#allocation13], %s2215_s14, %s2215_s14, %s2216_s24  }
  0x34   : > { %s2217_s21 = smov [#allocation6]   ;;  %s2218_s15 = smov [#allocation11]  }
  0x35   : > { %s327_s25 = sshll.u32 %s2217_s21, 4  ;;  %s350_s2 = sshll.u32 %s2218_s15, 4  ;;  %s328_s25 = int_to_ptr.vmem [resolvable:$true] %s327_s25  ;;  %s351_s2 = int_to_ptr.vmem [resolvable:$true] %s350_s2 }
  0x36   : > { %s2026_s29 = scalar_lea.vmem %s328_s25, 16  ;;  %s2033_s30 = scalar_lea.vmem %s328_s25, 32 }
  0x37   : > { %p2027_p9 = scmp.ne.s32.totalorder %s328_s25, %s2026_s29  ;;  %p2034_p2 = scmp.lt.s32.totalorder %s328_s25, %s328_s25 }
  0x38   : > { %p2035_p5 = scmp.lt.s32.totalorder %s2033_s30, %s2026_s29 }
  0x39   : > { %p2029_p12 = pnand %p2027_p9, %p2363_p0 }
  0x3a   : > { %p2036_p3 = por %p2035_p5, %p2034_p2 }
  0x3b   : > { %p2030_p1 = pneg %p2029_p12 }
  0x3d   : > { %p2037_p6 = pnand %p2036_p3, %p2030_p1 }
  0x3f   : > { %2040 = shalt.err (!%p2037_p6)
}
  0x40   : > { %1836 = dma.hbm_to_vmem [thread:$0]  (!%p2357_p13), %s2616_s1, 16, %s328_s25, [#allocation7]  }
  0x41   : > { %s2052_s28 = scalar_lea.vmem %s351_s2, 256  ;;  %p2060_p12 = scmp.lt.s32.totalorder %s351_s2, %s351_s2 }
  0x42   : > { %p2053_p7 = scmp.ne.s32.totalorder %s351_s2, %s2052_s28  ;;  %p2061_p4 = scmp.lt.s32.totalorder %s2052_s28, %s2052_s28 }
  0x44   : > { %p2055_p8 = pnand %p2053_p7, %p2363_p0  ;;  %p2062_p11 = por %p2061_p4, %p2060_p12 }
  0x46   : > { %p2056_p9 = pneg %p2055_p8 }
  0x48   : > { %p2063_p10 = pnand %p2062_p11, %p2056_p9 }
  0x4a   : > { %2066 = shalt.err (!%p2063_p10)
}
  0x4b   : > { %1842 = dma.hbm_to_vmem [thread:$0]  (!%p2357_p13), %s2618_s3, 256, %s351_s2, [#allocation10], %s2215_s14, %s2215_s14, %s2216_s24  }
  0x4c   : > { %s2219_s25 = smov [#allocation14]   ;;  %s2220_s30 = smov [#allocation15]  }
  0x4d   : > { %s381_s15 = sshll.u32 %s2219_s25, 4  ;;  %s398_s19 = sshll.u32 %s2220_s30, 4  ;;  %s382_s15 = int_to_ptr.vmem [resolvable:$true] %s381_s15  ;;  %s399_s19 = int_to_ptr.vmem [resolvable:$true] %s398_s19 }
  0x4e   : > { %s2078_s26 = scalar_lea.vmem %s382_s15, 256  ;;  %p2086_p11 = scmp.lt.s32.totalorder %s382_s15, %s382_s15 }
  0x4f   : > { %p2079_p8 = scmp.ne.s32.totalorder %s382_s15, %s2078_s26  ;;  %p2087_p1 = scmp.lt.s32.totalorder %s2078_s26, %s2078_s26 }
  0x51   : > { %p2081_p4 = pnand %p2079_p8, %p2363_p0  ;;  %p2088_p2 = por %p2087_p1, %p2086_p11 }
  0x53   : > { %p2082_p10 = pneg %p2081_p4 }
  0x55   : > { %p2089_p5 = pnand %p2088_p2, %p2082_p10 }
  0x57   : > { %2092 = shalt.err (!%p2089_p5)
}
  0x58   : > { %1848 = dma.hbm_to_vmem [thread:$0]  (!%p2357_p13), %s2621_s6, 256, %s382_s15, [#allocation13], %s2215_s14, %s2215_s14, %s2216_s24  }
  0x59   : > { %s2104_s29 = scalar_lea.vmem %s399_s19, 16  ;;  %s2111_s21 = scalar_lea.vmem %s399_s19, 32 }
  0x5a   : > { %p2105_p3 = scmp.ne.s32.totalorder %s399_s19, %s2104_s29  ;;  %p2112_p9 = scmp.lt.s32.totalorder %s399_s19, %s399_s19 }
  0x5b   : > { %p2113_p12 = scmp.lt.s32.totalorder %s2111_s21, %s2104_s29 }
  0x5c   : > { %p2107_p6 = pnand %p2105_p3, %p2363_p0 }
  0x5d   : > { %p2114_p8 = por %p2113_p12, %p2112_p9 }
  0x5e   : > { %p2108_p7 = pneg %p2107_p6 }
  0x60   : > { %p2115_p4 = pnand %p2114_p8, %p2108_p7 }
  0x62   : > { %2118 = shalt.err (!%p2115_p4)
}
  0x63   : > { %1851 = dma.hbm_to_vmem [thread:$0]  (!%p2357_p13), %s2623_s8, 16, %s399_s19, [#allocation16]  }
  0x64   : > { %p2648_p10 = scmp.ne.s32.totalorder %s2643_s12, 0 }
  0x65   : > { %p2649_p11 = scmp.ne.s32.totalorder (!%p2648_p10), %s2644_s13, 0 }
  0x66   : > { %424 = sbr.rel (%p2648_p10) target bundleno = 2162 (0x872), region = 64 }
  0x6b   : > { %2170 = dma.done.wait (%p2649_p11), [#allocation7], 16  }
  0x6c   : > { %2172 = vsyncadd (%p2649_p11), [#allocation7], 4294967280 }
  0x6d   : > { %2174 = dma.done.wait (%p2649_p11), [#allocation10], 512  }
  0x6e   : > { %2176 = vsyncadd (%p2649_p11), [#allocation10], 4294966784 }
  0x6f   : > { %2178 = dma.done.wait (%p2649_p11), [#allocation13], 512  }
  0x70   : > { %2180 = vsyncadd (%p2649_p11), [#allocation13], 4294966784 }
  0x71   : > { %2182 = dma.done.wait (%p2649_p11), [#allocation16], 16  }
  0x72   : > { %2184 = vsyncadd (%p2649_p11), [#allocation16], 4294967280  ;;  %p483_p13 = scmp.lt.s32.totalorder %s2203_s20, 1  ;;  %vm494_vm0 = vcmask 261120   ;;  %v1934_v3 = vld [vmem:[#allocation11 + $0x8] sm:$0xff]   ;;  %v1935_v4 = vld [vmem:[#allocation12 + $0x8] sm:$0xff]  }
  0x73   : > { %v2221_v5 = vmov 0.0   ;;  %v1936_v6 = vld [vmem:[#allocation11] sm:$0xff]   ;;  %v1937_v7 = vld [vmem:[#allocation12] sm:$0xff]   ;;  %vm2222_vm1 = vmmov 0   ;;  %v1640_v12 = vld [vmem:[#allocation6] ss:$0 sm:$0xff] }
  0x74   : > { %s484_s12 = scalar_select %p483_p13, %s2203_s20, 1  ;;  %1713 = vmatprep.subr.bf16.mxu0 %v2221_v5  ;;  %1721 = vmatprep.subr.bf16.mxu1 %v2221_v5  ;;  %vm512_vm2 = vcmask 257024   ;;  %v1938_v15 = vld [vmem:[#allocation9 + $0x8] sm:$0xff]   ;;  %v1939_v17 = vld [vmem:[#allocation9] sm:$0xff]   ;;  %vm647_vm3 = vcmask 60416   ;;  %vm808_vm4 = vcmask 1043456  }
  0x75   : > { %1714 = vmatpush3.bf16.msra.mxu0 %v1934_v3  ;;  %1722 = vmatpush3.bf16.msra.mxu1 %v1935_v4  ;;  %s2223_s13 = smov 112   ;;  %s2224_s15 = smov 120   ;;  %vm804_vm5 = vcmask 64512   ;;  %v802_v54 = vld [vmem:[#allocation14] sm:$0xff]   ;;  %v1040_v3 = vld [vmem:[#allocation14 + $0x8] sm:$0xff]   ;;  %vm1035_vm6 = vcmask 126016  }
  0x76   : > { %s1639_s16 = sshll.u32 %s484_s12, 3  ;;  %1715 = vmatprep.subr.bf16.mxu0 %v2221_v5  ;;  %1723 = vmatprep.subr.bf16.mxu1 %v2221_v5  ;;  %s2225_s19 = smov 104   ;;  %v803_v55 = vunpack.c.l.bf16 %v802_v54  ;;  %v918_v62 = vunpack.c.h.bf16 %v802_v54  ;;  %vm1157_vm7 = vcmask 191616   ;;  %vm1279_vm8 = vcmask 257216  }
  0x77   : > { %s486_s24 = scalar_lea.vmem %s2615_s0, %s1639_s16  ;;  %1717 = vmatprep.mubr.msk.bf16.mxu0 %vm2222_vm1, %v2221_v5  ;;  %1725 = vmatprep.mubr.msk.bf16.mxu1 %vm2222_vm1, %v2221_v5  ;;  %s2226_s26 = smov 8   ;;  %vm1425_vm9 = vcmask 130048  }
  0x78   : > { %v2444_v0 = vld [vmem:[%s486_s24] sm:$0xff]  ;;  %s2227_s25 = smov 16   ;;  %s2228_s16 = smov 24  }
  0x79   : > { %v493_v1 = vmul.f32 %v2444_v0, %v2444_v0  ;;  %1716 = vmatpush3.bf16.msra.mxu0 %v1936_v6  ;;  %1724 = vmatpush3.bf16.msra.mxu1 %v1937_v7  ;;  %v1041_v7 = vunpack.c.l.bf16 %v1040_v3  ;;  %s1673_s28 = sshll.u32 %s2203_s20, 7  ;;  %p2650_p1 = scmp.ne.s32.totalorder %s2639_s27, 0 }
  0x7a   : > { %1729 = vmatprep.subr.bf16.mxu0 %v2221_v5  ;;  %1737 = vmatprep.subr.bf16.mxu1 %v2221_v5  ;;  %s2574_s12 = scalar_lea.hbm %s2626_s11, %s1673_s28  ;;  %s2229_s20 = smov [#allocation17]  }
  0x7b   : > { %v495_v2 = vsel %vm494_vm0, %v493_v1, 0.0  ;;  %s2123_s14 = sshll.u32 %s2229_s20, 4  ;;  %s2124_s14 = int_to_ptr.vmem [resolvable:$false] %s2123_s14 }
  0x7c   : > { %496 = vadd.xlane.f32.xlu0 %v495_v2  ;;  %s2125_s24 = scalar_lea.vmem %s2124_s14, 256 }
 0x105   : > { %v497_v8 = vpop.xlane.xlu0 %496 }
 0x106   : > { %v499_v9 = vmul.f32 0.03125, %v497_v8 }
 0x108   : > { %v500_v10 = vadd.f32 1e-06, %v499_v9 }
 0x10a   : > { %1945 = vrsqrt.f32 %v500_v10 }
 0x117   : > { %v1946_v11 = vpop.eup %1945 }
 0x118   : > { %v502_v13 = vmul.f32 %v1946_v11, %v2444_v0 }
 0x11a   : > { %v510_v14 = vmul.f32 %v1640_v12, %v502_v13 }
 0x11c   : > { %v511_v16 = vpack.c.bf16 %v510_v14, %v510_v14  ;;  %v1163_v14 = vunpack.c.h.bf16 %v1040_v3 }
 0x11e   : > { %513 = vst.msk [vmem:[#allocation2] sm:$0xf] %vm512_vm2, %v511_v16  ;;  %1718 = vmatmul.mubr.msk.bf16.vlgmr.msra.gmra.mxu0 %vm494_vm0, %v511_v16  ;;  %1726 = vmatmul.mubr.msk.bf16.vlgmr.msra.gmra.mxu1 %vm494_vm0, %v511_v16 }
 0x11f   : > { %1730 = vmatpush3.bf16.msra.mxu0 %v1938_v15  ;;  %1733 = vmatprep.mubr.msk.bf16.mxu0 %vm2222_vm1, %v2221_v5 }
 0x120   : > { %1731 = vmatprep.subr.bf16.mxu0 %v2221_v5  ;;  %1739 = vmatprep.mubr.msk.bf16.mxu1 %vm2222_vm1, %v2221_v5 }
 0x123   : > { %1732 = vmatpush3.bf16.msra.mxu0 %v1939_v17 }
 0x124   : > { %1743 = vmatprep.subr.bf16.mxu0 %v2221_v5 }
 0x125   : > { %v739_v18 = vld [vmem:[#allocation2] sm:$0xf] }
 0x126   : > { %1734 = vmatmul.mubr.msk.bf16.vlgmr.msra.gmra.mxu0 %vm494_vm0, %v739_v18 }
 0x127   : > { %1745 = vmatprep.mubr.msk.bf16.mxu0 %vm2222_vm1, %v2221_v5 }
 0x1de   : > { %v567_v19 = vpop.f32.mrf.mxu0  ;;  %v624_v20 = vpop.f32.mrf.mxu1 }
 0x1df   : > { %v573_v21 = vpack.c.bf16 %v567_v19, %v567_v19  ;;  %v2471_v22 = vpack.c.bf16 %v624_v20, %v624_v20 }
 0x1e0   : > { %v1719_v23 = vpop.f32.mrf.mxu0  ;;  %v1727_v24 = vpop.f32.mrf.mxu1 }
 0x1e1   : > { %649 = vst.msk [vmem:[#allocation4] sm:$0xf] %vm647_vm3, %v2471_v22  ;;  %680 = vrot.lane.b32.xlu1 %v573_v21, %s2223_s13  ;;  %651 = vrot.lane.b32.xlu0 %v573_v21, %s2224_s15 }
 0x1e2   : > { %v570_v25 = vpop.f32.mrf.mxu0  ;;  %v627_v26 = vpop.f32.mrf.mxu1 }
 0x1e4   : > { %v1720_v27 = vpop.f32.mrf.mxu0  ;;  %v1728_v28 = vpop.f32.mrf.mxu1 }
 0x1e5   : > { %706 = vrot.lane.b32.xlu1 %v573_v21, %s2225_s19 }
 0x1e6   : > { %v794_v29 = vpop.f32.mrf.mxu0 }
 0x1e7   : > { %v800_v30 = vpack.c.bf16 %v794_v29, %v794_v29 }
 0x1e8   : > { %v1735_v31 = vpop.f32.mrf.mxu0  ;;  %v864_v32 = vld [vmem:[#allocation4] sm:$0xf] }
 0x1e9   : > { %1042 = vrot.lane.b32.xlu0 %v800_v30, %s2223_s13  ;;  %v869_v33 = vsel %vm808_vm4, %v864_v32, 0 }
 0x1ea   : > { %v797_v34 = vpop.f32.mrf.mxu0  ;;  %1744 = vmatpush3.bf16.msra.mxu0 %v869_v33 }
 0x1eb   : > { %1755 = vmatprep.subr.bf16.mxu0 %v2221_v5 }
 0x1ec   : > { %v1736_v35 = vpop.f32.mrf.mxu0 }
 0x208   : > { %631 = vxpose.xlu1.c.b16.start.end [1/1] (short) (narrow) %v573_v21, 16 }
 0x20c   : > { %920 = vrot.lane.b32.xlu1 %v800_v30, %s2224_s15 }
 0x210   : > { %1164 = vrot.lane.b32.xlu1 %v800_v30, %s2225_s19 }
 0x253   : > { %v681_v36 = vpop.permute.xlu1 %680  ;;  %v652_v37 = vpop.permute.xlu0 %651 }
 0x254   : > { %654 = vxpose.xlu0.c.b16.start.end [1/1] (short) (narrow) %v652_v37, 16  ;;  %683 = vxpose.xlu1.c.b16.start.end [1/1] (short) (narrow) %v681_v36, 16 }
 0x257   : > { %v707_v38 = vpop.permute.xlu1 %706 }
 0x258   : > { %709 = vxpose.xlu0.c.b16.start.end [1/1] (short) (narrow) %v707_v38, 16 }
 0x25b   : > { %v1043_v43 = vpop.permute.xlu0 %1042 }
 0x26a   : > { %v639_v39 = vpop.trf.xlu1 }
 0x26b   : > { %648 = vst.msk [vmem:[#allocation3] sm:$0xf] %vm647_vm3, %v639_v39 }
 0x272   : > { %v801_v40 = vld [vmem:[#allocation3] sm:$0xf] }
 0x273   : > { %v810_v41 = vsel %vm808_vm4, %v801_v40, 0 }
 0x274   : > { %1738 = vmatpush3.bf16.msra.mxu1 %v810_v41 }
 0x275   : > { %1749 = vmatprep.subr.bf16.mxu1 %v2221_v5 }
 0x277   : > { %1740 = vmatmul.mubr.msk.bf16.vlgmr.msra.gmra.mxu1 %vm804_vm5, %v800_v30 }
 0x278   : > { %1751 = vmatprep.mubr.msk.bf16.mxu1 %vm2222_vm1, %v2221_v5 }
 0x27e   : > { %v921_v42 = vpop.permute.xlu1 %920 }
 0x282   : > { %v1165_v44 = vpop.permute.xlu1 %1164 }
 0x2b6   : > { %v662_v45 = vpop.trf.xlu0  ;;  %v691_v46 = vpop.trf.xlu1 }
 0x2b7   : > { %671 = vst.msk [vmem:[#allocation3 + $0x4] sm:$0xf] %vm647_vm3, %v662_v45  ;;  %700 = vst.msk [vmem:[#allocation3 + $0x8] sm:$0xf] %vm647_vm3, %v691_v46 }
 0x2ba   : > { %v717_v47 = vpop.trf.xlu0 }
 0x2bb   : > { %726 = vst.msk [vmem:[#allocation3 + $0xc] sm:$0xf] %vm647_vm3, %v717_v47 }
 0x2be   : > { %v915_v48 = vld [vmem:[#allocation3 + $0x4] sm:$0xf]  ;;  %v1038_v49 = vld [vmem:[#allocation3 + $0x8] sm:$0xf] }
 0x2bf   : > { %v926_v50 = vsel %vm808_vm4, %v915_v48, 0  ;;  %v1048_v51 = vsel %vm808_vm4, %v1038_v49, 0 }
 0x2c0   : > { %1750 = vmatpush3.bf16.msra.mxu1 %v926_v50 }
 0x2c1   : > { %1761 = vmatprep.subr.bf16.mxu1 %v2221_v5 }
 0x2c2   : > { %v1160_v52 = vld [vmem:[#allocation3 + $0xc] sm:$0xf] }
 0x2c3   : > { %1752 = vmatmul.mubr.msk.bf16.vlgmr.msra.gmra.mxu1 %vm804_vm5, %v921_v42  ;;  %v1170_v53 = vsel %vm808_vm4, %v1160_v52, 0 }
 0x2c4   : > { %1762 = vmatpush3.bf16.msra.mxu1 %v1048_v51  ;;  %1763 = vmatprep.mubr.msk.bf16.mxu1 %vm2222_vm1, %v2221_v5 }
 0x2c5   : > { %1773 = vmatprep.subr.bf16.mxu1 %v2221_v5 }
 0x2cb   : > { %1764 = vmatmul.mubr.msk.bf16.vlgmr.msra.gmra.mxu1 %vm804_vm5, %v1043_v43 }
 0x2cc   : > { %1774 = vmatpush3.bf16.msra.mxu1 %v1170_v53  ;;  %1775 = vmatprep.mubr.msk.bf16.mxu1 %vm2222_vm1, %v2221_v5 }
 0x2cd   : > { %1785 = vmatprep.subr.bf16.mxu1 %v2221_v5 }
 0x2d3   : > { %1776 = vmatmul.mubr.msk.bf16.vlgmr.msra.gmra.mxu1 %vm804_vm5, %v1165_v44 }
 0x2d4   : > { %1789 = vmatprep.mubr.msk.bf16.mxu1 %vm2222_vm1, %v2221_v5 }
 0x337   : > { %v846_v56 = vpop.f32.mrf.mxu1 }
 0x338   : > { %v847_v57 = vadd.f32 %v846_v56, %v803_v55 }
 0x339   : > { %v1741_v58 = vpop.f32.mrf.mxu1 }
 0x33a   : > { %v852_v59 = vsel %vm804_vm5, %v847_v57, -inf }
 0x33b   : > { %853 = vmax.xlane.f32.xlu0 %v852_v59  ;;  %v849_v60 = vpop.f32.mrf.mxu1 }
 0x33d   : > { %v1742_v61 = vpop.f32.mrf.mxu1 }
 0x383   : > { %v962_v63 = vpop.f32.mrf.mxu1 }
 0x384   : > { %v963_v1 = vadd.f32 %v962_v63, %v918_v62 }
 0x385   : > { %v1753_v2 = vpop.f32.mrf.mxu1 }
 0x386   : > { %v968_v4 = vsel %vm804_vm5, %v963_v1, -inf }
 0x387   : > { %969 = vmax.xlane.f32.xlu0 %v968_v4  ;;  %v965_v6 = vpop.f32.mrf.mxu1 }
 0x389   : > { %v1754_v8 = vpop.f32.mrf.mxu1 }
 0x38b   : > { %v1084_v9 = vpop.f32.mrf.mxu1 }
 0x38c   : > { %v1085_v10 = vadd.f32 %v1084_v9, %v1041_v7 }
 0x38d   : > { %v1765_v11 = vpop.f32.mrf.mxu1 }
 0x38e   : > { %v1090_v12 = vsel %vm804_vm5, %v1085_v10, -inf }
 0x38f   : > { %1091 = vmax.xlane.f32.xlu0 %v1090_v12  ;;  %v1087_v13 = vpop.f32.mrf.mxu1 }
 0x391   : > { %v1766_v15 = vpop.f32.mrf.mxu1 }
 0x392   : > { %v1940_v15 = vld [vmem:[%s2620_s5 + $0x8] sm:$0xff]  }
 0x393   : > { %v1206_v16 = vpop.f32.mrf.mxu1  ;;  %1786 = vmatpush3.bf16.msra.mxu1 %v1940_v15 }
 0x394   : > { %v1207_v17 = vadd.f32 %v1206_v16, %v1163_v14  ;;  %1787 = vmatprep.subr.bf16.mxu1 %v2221_v5 }
 0x395   : > { %v1777_v18 = vpop.f32.mrf.mxu1 }
 0x396   : > { %v1212_v19 = vsel %vm804_vm5, %v1207_v17, -inf }
 0x397   : > { %1213 = vmax.xlane.f32.xlu0 %v1212_v19  ;;  %v1209_v20 = vpop.f32.mrf.mxu1 }
 0x399   : > { %v1778_v21 = vpop.f32.mrf.mxu1 }
 0x3c4   : > { %v854_v23 = vpop.xlane.xlu0 %853 }
 0x3c5   : > { %v855_v24 = vsub.f32 %v847_v57, %v854_v23  ;;  %v1942_v23 = vld [vmem:[%s2622_s7 + $0x8] sm:$0xff]  }
 0x3c7   : > { %v856_v25 = vmul.f32 1.442695, %v855_v24 }
 0x3c9   : > { %1947 = vpow2.f32 %v856_v25 }
 0x3d6   : > { %v1948_v26 = vpop.eup %1947 }
 0x3d7   : > { %v858_v27 = vsel %vm804_vm5, %v1948_v26, 0.0 }
 0x3d8   : > { %859 = vadd.xlane.f32.xlu1 %v858_v27 }
 0x3e9   : > { %675 = vrot.lane.b32.xlu1 %v2471_v22, %s2224_s15  ;;  %s480_s15 = sand.u32 1, %s2195_s18  }
 0x3ed   : > { %727 = vrot.lane.b32.xlu1 %v2471_v22, %s2225_s19  ;;  %s1638_s19 = sshll.u32 %s480_s15, 3 }
 0x3ee   : > { %s482_s29 = scalar_lea.vmem [#allocation17], %s1638_s19 }
 0x3ef   : > { %s1487_s21 = sshll.u32 %s482_s29, 4  ;;  %s1488_s21 = int_to_ptr.vmem [resolvable:$true] %s1487_s21 }
 0x3f0   : > { %s2119_s23 = scalar_lea.vmem %s1488_s21, 128  ;;  %p2126_p3 = scmp.lt.s32.totalorder %s1488_s21, %s2124_s14 }
 0x3f1   : > { %p2120_p0 = scmp.ne.s32.totalorder %s1488_s21, %s2119_s23  ;;  %p2127_p6 = scmp.lt.s32.totalorder %s2125_s24, %s2119_s23 }
 0x3f3   : > { %p2121_p2 = pnand %p2120_p0, %p2650_p1  ;;  %p2128_p7 = por %p2127_p6, %p2126_p3 }
 0x3f5   : > { %p2122_p5 = pneg %p2121_p2 }
 0x3f7   : > { %p2129_p9 = pnand %p2128_p7, %p2122_p5 }
 0x410   : > { %v970_v28 = vpop.xlane.xlu0 %969 }
 0x411   : > { %v971_v29 = vsub.f32 %v963_v1, %v970_v28 }
 0x413   : > { %v972_v30 = vmul.f32 1.442695, %v971_v29 }
 0x415   : > { %1949 = vpow2.f32 %v972_v30 }
 0x418   : > { %v1092_v31 = vpop.xlane.xlu0 %1091 }
 0x419   : > { %v1093_v32 = vsub.f32 %v1085_v10, %v1092_v31 }
 0x41b   : > { %v1094_v33 = vmul.f32 1.442695, %v1093_v32 }
 0x41d   : > { %1951 = vpow2.f32 %v1094_v33  ;;  %v1943_v33 = vld [vmem:[%s2622_s7] sm:$0xff]  }
 0x420   : > { %v1214_v34 = vpop.xlane.xlu0 %1213 }
 0x421   : > { %v1215_v35 = vsub.f32 %v1207_v17, %v1214_v34  ;;  %v1941_v17 = vld [vmem:[%s2620_s5] sm:$0xff]  }
 0x422   : > { %v1950_v36 = vpop.eup %1949  ;;  %1788 = vmatpush3.bf16.msra.mxu1 %v1941_v17 }
 0x423   : > { %v1216_v37 = vmul.f32 1.442695, %v1215_v35  ;;  %v974_v38 = vsel %vm804_vm5, %v1950_v36, 0.0  ;;  %1801 = vmatprep.subr.bf16.mxu1 %v2221_v5 }
 0x424   : > { %975 = vadd.xlane.f32.xlu0 %v974_v38 }
 0x425   : > { %1953 = vpow2.f32 %v1216_v37 }
 0x42a   : > { %v1952_v39 = vpop.eup %1951 }
 0x42b   : > { %v1096_v40 = vsel %vm804_vm5, %v1952_v39, 0.0 }
 0x42c   : > { %1097 = vadd.xlane.f32.xlu0 %v1096_v40  ;;  %v1665_v40 = vld [vmem:[#allocation15] ss:$0 sm:$0xff] }
 0x432   : > { %v1954_v41 = vpop.eup %1953 }
 0x433   : > { %v1218_v42 = vsel %vm804_vm5, %v1954_v41, 0.0 }
 0x434   : > { %1219 = vadd.xlane.f32.xlu0 %v1218_v42 }
 0x44a   : > { %701 = vrot.lane.b32.xlu0 %v2471_v22, %s2223_s13 }
 0x461   : > { %v860_v43 = vpop.xlane.xlu1 %859 }
 0x462   : > { %1955 = vrcp.f32 %v860_v43 }
 0x465   : > { %v676_v44 = vpop.permute.xlu1 %675 }
 0x466   : > { %679 = vst.msk [vmem:[#allocation4 + $0x4] sm:$0xf] %vm647_vm3, %v676_v44 }
 0x469   : > { %v728_v45 = vpop.permute.xlu1 %727 }
 0x46a   : > { %731 = vst.msk [vmem:[#allocation4 + $0xc] sm:$0xf] %vm647_vm3, %v728_v45 }
 0x46d   : > { %v981_v48 = vld [vmem:[#allocation4 + $0x4] sm:$0xf] }
 0x46e   : > { %v986_v50 = vsel %vm808_vm4, %v981_v48, 0 }
 0x46f   : > { %v1956_v46 = vpop.eup %1955 }
 0x470   : > { %v862_v47 = vmul.f32 %v1956_v46, %v1948_v26 }
 0x471   : > { %v1225_v61 = vld [vmem:[#allocation4 + $0xc] sm:$0xf] }
 0x472   : > { %v863_v49 = vpack.c.bf16 %v862_v47, %v862_v47  ;;  %v1230_v1 = vsel %vm808_vm4, %v1225_v61, 0  ;;  %v1669_v47 = vld [vmem:[%s2625_s10] ss:$0 sm:$0xff] }
 0x474   : > { %1746 = vmatmul.mubr.msk.bf16.vlgmr.msra.gmra.mxu0 %vm804_vm5, %v863_v49 }
 0x475   : > { %1756 = vmatpush3.bf16.msra.mxu0 %v986_v50  ;;  %1757 = vmatprep.mubr.msk.bf16.mxu0 %vm2222_vm1, %v2221_v5 }
 0x476   : > { %1767 = vmatprep.subr.bf16.mxu0 %v2221_v5 }
 0x4ad   : > { %v976_v22 = vpop.xlane.xlu0 %975 }
 0x4ae   : > { %1957 = vrcp.f32 %v976_v22 }
 0x4b5   : > { %v1098_v51 = vpop.xlane.xlu0 %1097 }
 0x4b6   : > { %1959 = vrcp.f32 %v1098_v51 }
 0x4bb   : > { %v1958_v52 = vpop.eup %1957 }
 0x4bc   : > { %v978_v53 = vmul.f32 %v1958_v52, %v1950_v36 }
 0x4bd   : > { %v1220_v54 = vpop.xlane.xlu0 %1219 }
 0x4be   : > { %v979_v55 = vpack.c.bf16 %v978_v53, %v978_v53  ;;  %1961 = vrcp.f32 %v1220_v54 }
 0x4c0   : > { %1758 = vmatmul.mubr.msk.bf16.vlgmr.msra.gmra.mxu0 %vm804_vm5, %v979_v55 }
 0x4c1   : > { %v702_v56 = vpop.permute.xlu0 %701  ;;  %1769 = vmatprep.mubr.msk.bf16.mxu0 %vm2222_vm1, %v2221_v5 }
 0x4c2   : > { %705 = vst.msk [vmem:[#allocation4 + $0x8] sm:$0xf] %vm647_vm3, %v702_v56 }
 0x4c3   : > { %v1960_v57 = vpop.eup %1959 }
 0x4c4   : > { %v1100_v58 = vmul.f32 %v1960_v57, %v1952_v39  ;;  %v1944_v39 = vld [vmem:[%s2624_s9] sm:$0xff]  }
 0x4c6   : > { %v1101_v62 = vpack.c.bf16 %v1100_v58, %v1100_v58 }
 0x4c9   : > { %v1103_v59 = vld [vmem:[#allocation4 + $0x8] sm:$0xf] }
 0x4ca   : > { %v1108_v60 = vsel %vm808_vm4, %v1103_v59, 0 }
 0x4cb   : > { %1768 = vmatpush3.bf16.msra.mxu0 %v1108_v60  ;;  %v1962_v63 = vpop.eup %1961 }
 0x4cc   : > { %1779 = vmatprep.subr.bf16.mxu0 %v2221_v5  ;;  %v1222_v2 = vmul.f32 %v1962_v63, %v1954_v41 }
 0x4ce   : > { %1770 = vmatmul.mubr.msk.bf16.vlgmr.msra.gmra.mxu0 %vm804_vm5, %v1101_v62  ;;  %v1223_v3 = vpack.c.bf16 %v1222_v2, %v1222_v2 }
 0x4cf   : > { %1780 = vmatpush3.bf16.msra.mxu0 %v1230_v1  ;;  %1781 = vmatprep.mubr.msk.bf16.mxu0 %vm2222_vm1, %v2221_v5 }
 0x4d0   : > { %1793 = vmatprep.subr.bf16.mxu0 %v2221_v5 }
 0x4d6   : > { %1782 = vmatmul.mubr.msk.bf16.vlgmr.msra.gmra.mxu0 %vm804_vm5, %v1223_v3 }
 0x4d7   : > { %1797 = vmatprep.mubr.msk.bf16.mxu0 %vm2222_vm1, %v2221_v5  ;;  %1794 = vmatpush3.bf16.msra.mxu0 %v1942_v23 }
 0x4d8   : > { %1795 = vmatprep.subr.bf16.mxu0 %v2221_v5 }
 0x4db   : > { %1796 = vmatpush3.bf16.msra.mxu0 %v1943_v33 }
 0x534   : > { %v905_v4 = vpop.f32.mrf.mxu0 }
 0x535   : > { %v911_v6 = vpack.c.bf16 %v905_v4, %v905_v4 }
 0x536   : > { %v1747_v7 = vpop.f32.mrf.mxu0 }
 0x537   : > { %913 = vst.msk [vmem:[#allocation5] sm:$0xf] %vm647_vm3, %v911_v6 }
 0x538   : > { %v908_v8 = vpop.f32.mrf.mxu0 }
 0x53a   : > { %v1748_v9 = vpop.f32.mrf.mxu0 }
 0x580   : > { %v1022_v10 = vpop.f32.mrf.mxu0 }
 0x581   : > { %v1677_v11 = vpack.c.bf16 %v1022_v10, %v1022_v10 }
 0x582   : > { %v1759_v12 = vpop.f32.mrf.mxu0 }
 0x583   : > { %1032 = vrot.lane.b32.xlu1 %v1677_v11, %s2226_s26 }
 0x584   : > { %v1025_v13 = vpop.f32.mrf.mxu0 }
 0x586   : > { %v1760_v14 = vpop.f32.mrf.mxu0 }
 0x58e   : > { %v1144_v16 = vpop.f32.mrf.mxu0 }
 0x58f   : > { %v1678_v18 = vpack.c.bf16 %v1144_v16, %v1144_v16 }
 0x590   : > { %v1771_v19 = vpop.f32.mrf.mxu0 }
 0x591   : > { %1154 = vrot.lane.b32.xlu0 %v1678_v18, %s2227_s25 }
 0x592   : > { %v1147_v20 = vpop.f32.mrf.mxu0 }
 0x594   : > { %v1772_v21 = vpop.f32.mrf.mxu0 }
 0x596   : > { %v1266_v24 = vpop.f32.mrf.mxu0 }
 0x597   : > { %v1679_v25 = vpack.c.bf16 %v1266_v24, %v1266_v24 }
 0x598   : > { %v1783_v26 = vpop.f32.mrf.mxu0 }
 0x599   : > { %1276 = vrot.lane.b32.xlu1 %v1679_v25, %s2228_s16  ;;  %s1473_s16 = scalar_lea.sflag [#allocation8], %s480_s15 }
 0x59a   : > { %v1269_v27 = vpop.f32.mrf.mxu0 }
 0x59c   : > { %v1784_v28 = vpop.f32.mrf.mxu0 }
 0x5f5   : > { %v1033_v29 = vpop.permute.xlu1 %1032 }
 0x5f6   : > { %1036 = vst.msk [vmem:[#allocation5] sm:$0xf] %vm1035_vm6, %v1033_v29 }
 0x603   : > { %v1155_v30 = vpop.permute.xlu0 %1154 }
 0x604   : > { %1158 = vst.msk [vmem:[#allocation5] sm:$0xf] %vm1157_vm7, %v1155_v30 }
 0x60b   : > { %v1277_v31 = vpop.permute.xlu1 %1276 }
 0x60c   : > { %1280 = vst.msk [vmem:[#allocation5] sm:$0xf] %vm1279_vm8, %v1277_v31 }
 0x613   : > { %v1281_v32 = vld [vmem:[#allocation5] sm:$0xf] }
 0x614   : > { %1790 = vmatmul.mubr.msk.bf16.vlgmr.msra.gmra.mxu1 %vm494_vm0, %v1281_v32 }
 0x615   : > { %1803 = vmatprep.mubr.msk.bf16.mxu1 %vm2222_vm1, %v2221_v5  ;;  %1802 = vmatpush3.bf16.msra.mxu1 %v1944_v39 }
 0x6d4   : > { %v1335_v34 = vpop.f32.mrf.mxu1 }
 0x6d5   : > { %v1341_v35 = vpack.c.bf16 %v1335_v34, %v1335_v34 }
 0x6d6   : > { %v1791_v36 = vpop.f32.mrf.mxu1 }
 0x6d7   : > { %1798 = vmatmul.mubr.msk.bf16.vlgmr.msra.gmra.mxu0 %vm494_vm0, %v1341_v35 }
 0x6d8   : > { %v1338_v37 = vpop.f32.mrf.mxu1 }
 0x6da   : > { %v1792_v38 = vpop.f32.mrf.mxu1 }
 0x797   : > { %v1402_v5 = vpop.f32.mrf.mxu0 }
 0x798   : > { %v1403_v41 = vadd.f32 %v1665_v40, %v1402_v5 }
 0x799   : > { %v1799_v42 = vpop.f32.mrf.mxu0 }
 0x79a   : > { %v1408_v43 = vmax.f32 %v1403_v41, 0.0 }
 0x79b   : > { %v1405_v44 = vpop.f32.mrf.mxu0 }
 0x79c   : > { %v1409_v45 = vpack.c.bf16 %v1408_v43, %v1408_v43 }
 0x79d   : > { %v1800_v46 = vpop.f32.mrf.mxu0 }
 0x79e   : > { %1804 = vmatmul.mubr.msk.bf16.vlgmr.msra.gmra.mxu1 %vm1425_vm9, %v1409_v45 }
 0x85e   : > { %v1463_v48 = vpop.f32.mrf.mxu1 }
 0x85f   : > { %v1464_v49 = vadd.f32 %v1669_v47, %v1463_v48 }
 0x860   : > { %v1805_v50 = vpop.f32.mrf.mxu1 }
 0x861   : > { %v1469_v22 = vadd.f32 %v1464_v49, %v1335_v34 }
 0x862   : > { %v1466_v51 = vpop.f32.mrf.mxu1 }
 0x863   : > { %v1470_v52 = vadd.f32 %v1469_v22, %v2444_v0 }
 0x864   : > { %v1806_v53 = vpop.f32.mrf.mxu1 }
 0x865   : > { %1471 = vst.msk [vmem:[%s482_s29] sm:$0xff] %vm494_vm0, %v1470_v52 }
 0x866   : > { %2132 = shalt.err (!%p2129_p9)
}
 0x867   : > { %s2133_s13 = scalar_lea.hbm %s2574_s12, 128  ;;  %s2137_s26 = scalar_lea.hbm %s2626_s11, 256 }
 0x868   : > { %p2134_p12 = scmp.ne.s32.totalorder %s2574_s12, %s2133_s13  ;;  %p2138_p10 = scmp.lt.s32.totalorder %s2574_s12, %s2626_s11 }
 0x869   : > { %p2139_p11 = scmp.lt.s32.totalorder %s2137_s26, %s2133_s13 }
 0x86a   : > { %p2135_p8 = pnand %p2134_p12, %p2650_p1 }
 0x86b   : > { %p2140_p13 = por %p2139_p11, %p2138_p10 }
 0x86c   : > { %p2136_p4 = pneg %p2135_p8 }
 0x86e   : > { %p2141_p0 = pnand %p2140_p13, %p2136_p4 }
 0x870   : > { %2144 = shalt.err (!%p2141_p0)
}
 0x871   : > { %1831 = dma.vmem_to_hbm [thread:$0]  (%p2650_p1), %s1488_s21, 128, %s2574_s12, %s1473_s16  }
 0x872 PF: > { %s2651_s29 = sld [smem:[#allocation26_spill]]  ;;  %p1868_p2 = scmp.ge.s32.totalorder %s2211_s22, 2 }
 0x873   : > { %s1499_s25 = sand.u32 1, %s2191_s17  }
 0x874   : > { %s1500_s30 = scalar_lea.sflag [#allocation8], %s1499_s25 }
 0x878   : > { %p2652_p5 = scmp.ne.s32.totalorder %s2651_s29, 0 }
 0x87a   : > { %p1853_p3 = pnand %p1868_p2, %p2652_p5 }
 0x87c   : > { %p1854_p6 = pneg %p1853_p3 }
 0x87e   : > { %2186 = dma.done.wait (%p1854_p6), %s1500_s30, 128  }
 0x87f   : > { %2188 = vsyncadd (%p1854_p6), %s1500_s30, 4294967168  ;;  %s28_s22 = sadd.s32 1, %s2211_s22   ;;  %s2653_s23 = sld [smem:[#allocation23_spill]] }
 0x880   : > { %p25_p7 = scmp.ge.s32.totalorder %s28_s22, 4   ;;  %s2654_s19 = sld [smem:[#allocation27_spill]] }
 0x881   : > { %s2655_s20 = sld [smem:[#allocation24_spill]]  ;;  %s2657_s17 = smov %s2195_s18 }
 0x882   : > { %s2656_s21 = sld [smem:[#allocation25_spill]]  ;;  %27 = sbr.rel (!%p25_p7) target bundleno = 10 (0xa), region = 146 }
 0x885   : > { %s2658_s18 = smov %s2653_s23 }
 0x887   :  { %1505 = vsyncpa [#allocation7], 1 }
 0x888   :  { %1507 = vsyncpa [#allocation7 + $0x1], 1 }
 0x889   :  { %1508 = vsyncpa [#allocation10], 1 }
 0x88a   :  { %1509 = vsyncpa [#allocation13], 1 }
 0x88b   :  { %1510 = vsyncpa [#allocation16], 1 }
 0x88c   :  { %1511 = vsyncpa [#allocation8], 1 }
 0x88d   :  { %1513 = vsyncpa [#allocation8 + $0x1], 1 }

</bundles_post_ra>
